<compile_context>
chip_gen: v6e
topology: v6e:2x2x1
jax: 0.10.0
libtpu: 0.0.40
codegen_flags: <defaults>
</compile_context>

<pallas_src>
import jax
import jax.numpy as jnp
from jax.experimental import pallas as pl
from jax.experimental.pallas import tpu as pltpu


def _cnn1_kernel(x_ref, w1_ref, b1_ref, w2_ref, b2_ref, w3_ref, b3_ref,
                 w0e_ref, b0_ref, wf_ref, bf_ref, o_ref, pad_ref):
    """Full Cnn1 forward for one batch element (everything stays in VMEM)."""
    f32 = jnp.float32
    L = x_ref.shape[-1]            # 128
    L3 = L - 2                     # 126 = conv3 output length (k=5, pad=1)

    def conv_relu(h, w_ref, b_ref):
        # 1D conv (padding=1) + bias + ReLU via K shifted matmuls.
        #   h:     (c_in, L) activation value
        #   w_ref: (K, 16, c_in) weight ref (tap-major, pre-transposed on host)
        #   b_ref: (16, 1) bias ref
        K, n_out, c_in = w_ref.shape
        l_out = L + 2 - K + 1
        pad_ref[...] = jnp.zeros_like(pad_ref)         # zero-pad border
        pad_ref[0:c_in, 1:1 + L] = h                   # place input at offset P=1
        acc = jnp.zeros((n_out, l_out), f32)
        for k in range(K):                             # static, unrolled
            acc = acc + jnp.dot(w_ref[k], pad_ref[0:c_in, k:k + l_out],
                                preferred_element_type=f32)
        return jnp.maximum(acc + b_ref[...], 0.0)

    x = x_ref[0]                                       # (6, 128)
    h = conv_relu(x, w1_ref, b1_ref)                   # (16, 128)
    h = conv_relu(h, w2_ref, b2_ref)                   # (16, 128)
    h = conv_relu(h, w3_ref, b3_ref)                   # (16, 126)

    # TODO(synk): nn.Dropout(p=0.5) is treated as identity (eval-mode forward).

    # MaxPool1d(kernel=2, stride=2): pooled[c, j] = max(h[c, 2j], h[c, 2j+1]).
    # Keep it "uncompacted" (pooled values live at even lanes); the even-lane
    # selection + channel-major flatten are folded into the expanded fc0 weight.
    pad_ref[...] = jnp.zeros_like(pad_ref)
    pad_ref[:, 0:L3] = h
    m = jnp.maximum(h, pad_ref[:, 1:1 + L3])           # (16, 126)

    # fc0 + ReLU: contraction over (channel, lane) via 16 small MXU matmuls.
    acc0 = b0_ref[...]                                 # (1, 100)
    for c in range(w0e_ref.shape[0]):                  # static, unrolled
        acc0 = acc0 + jnp.dot(m[c:c + 1, :], w0e_ref[c],
                              preferred_element_type=f32)
    h4 = jnp.maximum(acc0, 0.0)                        # (1, 100)

    # fc
    out = jnp.dot(h4, wf_ref[...], preferred_element_type=f32) + bf_ref[...]
    o_ref[0] = out.astype(o_ref.dtype)                 # (1, n_classes)


def cnn1_forward(x, params):
    """Pallas forward pass of Cnn1 (eval mode). x: (B, 6, 128) float32."""
    w1, b1, w2, b2, w3, b3, w0, b0, wf, bf = params
    B, c_in, L = x.shape
    assert (c_in, L) == (6, 128)
    L3 = L - 2                     # conv3 output length
    Lp = L3 // 2                   # pooled length = 63
    n_hidden = w0.shape[0]         # 100
    n_classes = wf.shape[0]
    assert w0.shape[1] == 16 * Lp  # 1008

    # ---- one-time host-side weight re-layouts (pure metadata / tiny) ----
    w1k = jnp.transpose(w1, (2, 0, 1))                 # (3, 16, 6)
    w2k = jnp.transpose(w2, (2, 0, 1))                 # (3, 16, 16)
    w3k = jnp.transpose(w3, (2, 0, 1))                 # (5, 16, 16)
    b1k = b1.reshape(-1, 1)
    b2k = b2.reshape(-1, 1)
    b3k = b3.reshape(-1, 1)
    # Fold maxpool selection + flatten into fc0: pooled (c, j) lives at lane 2j
    # of the in-kernel max tensor, so place fc0 column (c*63 + j) at [c, 2j, :].
    w0r = jnp.transpose(w0.reshape(n_hidden, 16, Lp), (1, 2, 0))   # (16, 63, 100)
    w0e = jnp.zeros((16, L3, n_hidden), w0.dtype).at[:, 0::2, :].set(w0r)
    b0k = b0.reshape(1, -1)
    wfk = wf.T                                          # (100, n_classes)
    bfk = bf.reshape(1, -1)

    out = pl.pallas_call(
        _cnn1_kernel,
        out_shape=jax.ShapeDtypeStruct((B, 1, n_classes), jnp.float32),
        grid_spec=pltpu.PrefetchScalarGridSpec(
            num_scalar_prefetch=0,
            grid=(B,),
            in_specs=[
                pl.BlockSpec((1, c_in, L), lambda b: (b, 0, 0)),   # x
                pl.BlockSpec(w1k.shape, lambda b: (0, 0, 0)),
                pl.BlockSpec(b1k.shape, lambda b: (0, 0)),
                pl.BlockSpec(w2k.shape, lambda b: (0, 0, 0)),
                pl.BlockSpec(b2k.shape, lambda b: (0, 0)),
                pl.BlockSpec(w3k.shape, lambda b: (0, 0, 0)),
                pl.BlockSpec(b3k.shape, lambda b: (0, 0)),
                pl.BlockSpec(w0e.shape, lambda b: (0, 0, 0)),
                pl.BlockSpec(b0k.shape, lambda b: (0, 0)),
                pl.BlockSpec(wfk.shape, lambda b: (0, 0)),
                pl.BlockSpec(bfk.shape, lambda b: (0, 0)),
            ],
            out_specs=pl.BlockSpec((1, 1, n_classes), lambda b: (b, 0, 0)),
            # zero-padded staging buffer: 16 channels x (L + pad slack)
            scratch_shapes=[pltpu.VMEM((16, L + 4), jnp.float32)],
        ),
        compiler_params=pltpu.CompilerParams(
            dimension_semantics=("parallel",),     # batch -> both TCs on v7x
        ),
    )(x, w1k, b1k, w2k, b2k, w3k, b3k, w0e, b0k, wfk, bfk)
    return out.reshape(B, n_classes)


def cnn1_reference(x, params):
    """Pure-JAX reference (eval mode) used only for the correctness check."""
    w1, b1, w2, b2, w3, b3, w0, b0, wf, bf = params
    hi = jax.lax.Precision.HIGHEST

    def conv1d(h, w, b):
        y = jax.lax.conv_general_dilated(
            h, w, window_strides=(1,), padding=[(1, 1)],
            dimension_numbers=("NCH", "OIH", "NCH"), precision=hi)
        return y + b[None, :, None]

    h = jax.nn.relu(conv1d(x, w1, b1))
    h = jax.nn.relu(conv1d(h, w2, b2))
    h = jax.nn.relu(conv1d(h, w3, b3))
    B, C, L3 = h.shape
    h = h.reshape(B, C, L3 // 2, 2).max(axis=-1)        # MaxPool1d(2)
    h = h.reshape(B, -1)                                 # (B, 1008)
    h = jax.nn.relu(jnp.dot(h, w0.T, precision=hi) + b0)
    return jnp.dot(h, wf.T, precision=hi) + bf


if __name__ == "__main__":
    key = jax.random.PRNGKey(0)
    ks = jax.random.split(key, 11)
    B, L, n_classes = 2, 128, 10   # 16 * ((128 - 2) // 2) = 1008 -> matches fc0

    def init(k, shape, scale):
        return scale * jax.random.normal(k, shape, dtype=jnp.float32)

    x = jax.random.normal(ks[0], (B, 6, L), dtype=jnp.float32)
    params = (
        init(ks[1], (16, 6, 3), 0.20),       init(ks[2], (16,), 0.10),
        init(ks[3], (16, 16, 3), 0.15),      init(ks[4], (16,), 0.10),
        init(ks[5], (16, 16, 5), 0.10),      init(ks[6], (16,), 0.10),
        init(ks[7], (100, 1008), 0.03),      init(ks[8], (100,), 0.10),
        init(ks[9], (n_classes, 100), 0.10), init(ks[10], (n_classes,), 0.10),
    )

    y = jax.jit(cnn1_forward)(x, params)
    y = jax.block_until_ready(y)

    ref = cnn1_reference(x, params)
    assert y.shape == (B, n_classes)
    assert y.dtype == jnp.float32
    err = float(jnp.max(jnp.abs(y - ref)))
    assert err < 1e-2, f"max abs error {err}"
    print("KERNEL_OK")
</pallas_src>

<mosaic_0001>
module attributes {stable_mosaic.version = 11 : i64} {
  func.func @_cnn1_kernel(%arg0: i32, %arg1: memref<1x6x128xf32, #tpu.memory_space<vmem>>, %arg2: memref<3x16x6xf32, #tpu.memory_space<vmem>>, %arg3: memref<16x1xf32, #tpu.memory_space<vmem>>, %arg4: memref<3x16x16xf32, #tpu.memory_space<vmem>>, %arg5: memref<16x1xf32, #tpu.memory_space<vmem>>, %arg6: memref<5x16x16xf32, #tpu.memory_space<vmem>>, %arg7: memref<16x1xf32, #tpu.memory_space<vmem>>, %arg8: memref<16x126x100xf32, #tpu.memory_space<vmem>>, %arg9: memref<1x100xf32, #tpu.memory_space<vmem>>, %arg10: memref<100x10xf32, #tpu.memory_space<vmem>>, %arg11: memref<1x10xf32, #tpu.memory_space<vmem>>, %arg12: memref<1x1x10xf32, #tpu.memory_space<vmem>>, %arg13: memref<16x132xf32, #tpu.memory_space<vmem>>) attributes {dimension_semantics = [#tpu.dimension_semantics<parallel>], iteration_bounds = array<i64: 2>, scalar_prefetch = 0 : i64, scratch_operands = 1 : i64, tpu.core_type = #tpu.core_type<tc>, window_params = [{transform_indices = @transform_0, window_bounds = array<i64: 1, 6, 128>}, {pipeline_mode = #tpu.pipeline_mode<synchronous>, transform_indices = @transform_1, window_bounds = array<i64: 3, 16, 6>}, {pipeline_mode = #tpu.pipeline_mode<synchronous>, transform_indices = @transform_2, window_bounds = array<i64: 16, 1>}, {pipeline_mode = #tpu.pipeline_mode<synchronous>, transform_indices = @transform_3, window_bounds = array<i64: 3, 16, 16>}, {pipeline_mode = #tpu.pipeline_mode<synchronous>, transform_indices = @transform_4, window_bounds = array<i64: 16, 1>}, {pipeline_mode = #tpu.pipeline_mode<synchronous>, transform_indices = @transform_5, window_bounds = array<i64: 5, 16, 16>}, {pipeline_mode = #tpu.pipeline_mode<synchronous>, transform_indices = @transform_6, window_bounds = array<i64: 16, 1>}, {pipeline_mode = #tpu.pipeline_mode<synchronous>, transform_indices = @transform_7, window_bounds = array<i64: 16, 126, 100>}, {pipeline_mode = #tpu.pipeline_mode<synchronous>, transform_indices = @transform_8, window_bounds = array<i64: 1, 100>}, {pipeline_mode = #tpu.pipeline_mode<synchronous>, transform_indices = @transform_9, window_bounds = array<i64: 100, 10>}, {pipeline_mode = #tpu.pipeline_mode<synchronous>, transform_indices = @transform_10, window_bounds = array<i64: 1, 10>}, {transform_indices = @transform_11, window_bounds = array<i64: 1, 1, 10>}]} {
    %c0 = arith.constant 0 : index
    %c0_0 = arith.constant 0 : index
    %c0_1 = arith.constant 0 : index
    %0 = vector.load %arg1[%c0, %c0_0, %c0_1] : memref<1x6x128xf32, #tpu.memory_space<vmem>>, vector<1x6x128xf32>
    %1 = vector.shape_cast %0 : vector<1x6x128xf32> to vector<6x128xf32>
    %cst = arith.constant 0.000000e+00 : f32
    %2 = vector.broadcast %cst : f32 to vector<16x132xf32>
    %c0_2 = arith.constant 0 : index
    %c0_3 = arith.constant 0 : index
    %3 = vector.load %arg13[%c0_2, %c0_3] : memref<16x132xf32, #tpu.memory_space<vmem>>, vector<16x132xf32>
    tpu.vector_store %arg13[%c0_2, %c0_3], %2 {strides = array<i32>} : memref<16x132xf32, #tpu.memory_space<vmem>>, vector<16x132xf32>,
    %c0_4 = arith.constant 0 : index
    %c1 = arith.constant 1 : index
    %4 = vector.load %arg13[%c0_4, %c1] : memref<16x132xf32, #tpu.memory_space<vmem>>, vector<6x128xf32>
    tpu.vector_store %arg13[%c0_4, %c1], %1 {strides = array<i32>} : memref<16x132xf32, #tpu.memory_space<vmem>>, vector<6x128xf32>,
    %cst_5 = arith.constant 0.000000e+00 : f32
    %5 = vector.broadcast %cst_5 : f32 to vector<16x128xf32>
    %c0_6 = arith.constant 0 : index
    %c0_7 = arith.constant 0 : index
    %c0_8 = arith.constant 0 : index
    %6 = vector.load %arg2[%c0_6, %c0_7, %c0_8] : memref<3x16x6xf32, #tpu.memory_space<vmem>>, vector<1x16x6xf32>
    %7 = vector.shape_cast %6 : vector<1x16x6xf32> to vector<16x6xf32>
    %c0_9 = arith.constant 0 : index
    %c0_10 = arith.constant 0 : index
    %8 = vector.load %arg13[%c0_9, %c0_10] : memref<16x132xf32, #tpu.memory_space<vmem>>, vector<6x128xf32>
    %cst_11 = arith.constant dense<0.000000e+00> : vector<16x128xf32>
    %9 = tpu.matmul %7, %8, %cst_11 {dimension_numbers = #tpu.dot_dimension_numbers<[1], [0], [0], [1], [0, 0, 1, 1], [], []>} : vector<16x6xf32>, vector<6x128xf32>, vector<16x128xf32> -> vector<16x128xf32>
    %10 = arith.addf %5, %9 : vector<16x128xf32>
    %c1_12 = arith.constant 1 : index
    %c0_13 = arith.constant 0 : index
    %c0_14 = arith.constant 0 : index
    %11 = vector.load %arg2[%c1_12, %c0_13, %c0_14] : memref<3x16x6xf32, #tpu.memory_space<vmem>>, vector<1x16x6xf32>
    %12 = vector.shape_cast %11 : vector<1x16x6xf32> to vector<16x6xf32>
    %c0_15 = arith.constant 0 : index
    %c1_16 = arith.constant 1 : index
    %13 = vector.load %arg13[%c0_15, %c1_16] : memref<16x132xf32, #tpu.memory_space<vmem>>, vector<6x128xf32>
    %cst_17 = arith.constant dense<0.000000e+00> : vector<16x128xf32>
    %14 = tpu.matmul %12, %13, %cst_17 {dimension_numbers = #tpu.dot_dimension_numbers<[1], [0], [0], [1], [0, 0, 1, 1], [], []>} : vector<16x6xf32>, vector<6x128xf32>, vector<16x128xf32> -> vector<16x128xf32>
    %15 = arith.addf %10, %14 : vector<16x128xf32>
    %c2 = arith.constant 2 : index
    %c0_18 = arith.constant 0 : index
    %c0_19 = arith.constant 0 : index
    %16 = vector.load %arg2[%c2, %c0_18, %c0_19] : memref<3x16x6xf32, #tpu.memory_space<vmem>>, vector<1x16x6xf32>
    %17 = vector.shape_cast %16 : vector<1x16x6xf32> to vector<16x6xf32>
    %c0_20 = arith.constant 0 : index
    %c2_21 = arith.constant 2 : index
    %18 = vector.load %arg13[%c0_20, %c2_21] : memref<16x132xf32, #tpu.memory_space<vmem>>, vector<6x128xf32>
    %cst_22 = arith.constant dense<0.000000e+00> : vector<16x128xf32>
    %19 = tpu.matmul %17, %18, %cst_22 {dimension_numbers = #tpu.dot_dimension_numbers<[1], [0], [0], [1], [0, 0, 1, 1], [], []>} : vector<16x6xf32>, vector<6x128xf32>, vector<16x128xf32> -> vector<16x128xf32>
    %20 = arith.addf %15, %19 : vector<16x128xf32>
    %c0_23 = arith.constant 0 : index
    %c0_24 = arith.constant 0 : index
    %21 = vector.load %arg3[%c0_23, %c0_24] : memref<16x1xf32, #tpu.memory_space<vmem>>, vector<16x1xf32>
    %22 = vector.broadcast %21 : vector<16x1xf32> to vector<16x128xf32>
    %23 = arith.addf %20, %22 : vector<16x128xf32>
    %cst_25 = arith.constant 0.000000e+00 : f32
    %24 = vector.broadcast %cst_25 : f32 to vector<16x128xf32>
    %25 = arith.maximumf %23, %24 : vector<16x128xf32>
    %cst_26 = arith.constant 0.000000e+00 : f32
    %26 = vector.broadcast %cst_26 : f32 to vector<16x132xf32>
    %c0_27 = arith.constant 0 : index
    %c0_28 = arith.constant 0 : index
    %27 = vector.load %arg13[%c0_27, %c0_28] : memref<16x132xf32, #tpu.memory_space<vmem>>, vector<16x132xf32>
    tpu.vector_store %arg13[%c0_27, %c0_28], %26 {strides = array<i32>} : memref<16x132xf32, #tpu.memory_space<vmem>>, vector<16x132xf32>,
    %c0_29 = arith.constant 0 : index
    %c1_30 = arith.constant 1 : index
    %28 = vector.load %arg13[%c0_29, %c1_30] : memref<16x132xf32, #tpu.memory_space<vmem>>, vector<16x128xf32>
    tpu.vector_store %arg13[%c0_29, %c1_30], %25 {strides = array<i32>} : memref<16x132xf32, #tpu.memory_space<vmem>>, vector<16x128xf32>,
    %cst_31 = arith.constant 0.000000e+00 : f32
    %29 = vector.broadcast %cst_31 : f32 to vector<16x128xf32>
    %c0_32 = arith.constant 0 : index
    %c0_33 = arith.constant 0 : index
    %c0_34 = arith.constant 0 : index
    %30 = vector.load %arg4[%c0_32, %c0_33, %c0_34] : memref<3x16x16xf32, #tpu.memory_space<vmem>>, vector<1x16x16xf32>
    %31 = vector.shape_cast %30 : vector<1x16x16xf32> to vector<16x16xf32>
    %c0_35 = arith.constant 0 : index
    %c0_36 = arith.constant 0 : index
    %32 = vector.load %arg13[%c0_35, %c0_36] : memref<16x132xf32, #tpu.memory_space<vmem>>, vector<16x128xf32>
    %cst_37 = arith.constant dense<0.000000e+00> : vector<16x128xf32>
    %33 = tpu.matmul %31, %32, %cst_37 {dimension_numbers = #tpu.dot_dimension_numbers<[1], [0], [0], [1], [0, 0, 1, 1], [], []>} : vector<16x16xf32>, vector<16x128xf32>, vector<16x128xf32> -> vector<16x128xf32>
    %34 = arith.addf %29, %33 : vector<16x128xf32>
    %c1_38 = arith.constant 1 : index
    %c0_39 = arith.constant 0 : index
    %c0_40 = arith.constant 0 : index
    %35 = vector.load %arg4[%c1_38, %c0_39, %c0_40] : memref<3x16x16xf32, #tpu.memory_space<vmem>>, vector<1x16x16xf32>
    %36 = vector.shape_cast %35 : vector<1x16x16xf32> to vector<16x16xf32>
    %c0_41 = arith.constant 0 : index
    %c1_42 = arith.constant 1 : index
    %37 = vector.load %arg13[%c0_41, %c1_42] : memref<16x132xf32, #tpu.memory_space<vmem>>, vector<16x128xf32>
    %cst_43 = arith.constant dense<0.000000e+00> : vector<16x128xf32>
    %38 = tpu.matmul %36, %37, %cst_43 {dimension_numbers = #tpu.dot_dimension_numbers<[1], [0], [0], [1], [0, 0, 1, 1], [], []>} : vector<16x16xf32>, vector<16x128xf32>, vector<16x128xf32> -> vector<16x128xf32>
    %39 = arith.addf %34, %38 : vector<16x128xf32>
    %c2_44 = arith.constant 2 : index
    %c0_45 = arith.constant 0 : index
    %c0_46 = arith.constant 0 : index
    %40 = vector.load %arg4[%c2_44, %c0_45, %c0_46] : memref<3x16x16xf32, #tpu.memory_space<vmem>>, vector<1x16x16xf32>
    %41 = vector.shape_cast %40 : vector<1x16x16xf32> to vector<16x16xf32>
    %c0_47 = arith.constant 0 : index
    %c2_48 = arith.constant 2 : index
    %42 = vector.load %arg13[%c0_47, %c2_48] : memref<16x132xf32, #tpu.memory_space<vmem>>, vector<16x128xf32>
    %cst_49 = arith.constant dense<0.000000e+00> : vector<16x128xf32>
    %43 = tpu.matmul %41, %42, %cst_49 {dimension_numbers = #tpu.dot_dimension_numbers<[1], [0], [0], [1], [0, 0, 1, 1], [], []>} : vector<16x16xf32>, vector<16x128xf32>, vector<16x128xf32> -> vector<16x128xf32>
    %44 = arith.addf %39, %43 : vector<16x128xf32>
    %c0_50 = arith.constant 0 : index
    %c0_51 = arith.constant 0 : index
    %45 = vector.load %arg5[%c0_50, %c0_51] : memref<16x1xf32, #tpu.memory_space<vmem>>, vector<16x1xf32>
    %46 = vector.broadcast %45 : vector<16x1xf32> to vector<16x128xf32>
    %47 = arith.addf %44, %46 : vector<16x128xf32>
    %cst_52 = arith.constant 0.000000e+00 : f32
    %48 = vector.broadcast %cst_52 : f32 to vector<16x128xf32>
    %49 = arith.maximumf %47, %48 : vector<16x128xf32>
    %cst_53 = arith.constant 0.000000e+00 : f32
    %50 = vector.broadcast %cst_53 : f32 to vector<16x132xf32>
    %c0_54 = arith.constant 0 : index
    %c0_55 = arith.constant 0 : index
    %51 = vector.load %arg13[%c0_54, %c0_55] : memref<16x132xf32, #tpu.memory_space<vmem>>, vector<16x132xf32>
    tpu.vector_store %arg13[%c0_54, %c0_55], %50 {strides = array<i32>} : memref<16x132xf32, #tpu.memory_space<vmem>>, vector<16x132xf32>,
    %c0_56 = arith.constant 0 : index
    %c1_57 = arith.constant 1 : index
    %52 = vector.load %arg13[%c0_56, %c1_57] : memref<16x132xf32, #tpu.memory_space<vmem>>, vector<16x128xf32>
    tpu.vector_store %arg13[%c0_56, %c1_57], %49 {strides = array<i32>} : memref<16x132xf32, #tpu.memory_space<vmem>>, vector<16x128xf32>,
    %cst_58 = arith.constant 0.000000e+00 : f32
    %53 = vector.broadcast %cst_58 : f32 to vector<16x126xf32>
    %c0_59 = arith.constant 0 : index
    %c0_60 = arith.constant 0 : index
    %c0_61 = arith.constant 0 : index
    %54 = vector.load %arg6[%c0_59, %c0_60, %c0_61] : memref<5x16x16xf32, #tpu.memory_space<vmem>>, vector<1x16x16xf32>
    %55 = vector.shape_cast %54 : vector<1x16x16xf32> to vector<16x16xf32>
    %c0_62 = arith.constant 0 : index
    %c0_63 = arith.constant 0 : index
    %56 = vector.load %arg13[%c0_62, %c0_63] : memref<16x132xf32, #tpu.memory_space<vmem>>, vector<16x126xf32>
    %cst_64 = arith.constant dense<0.000000e+00> : vector<16x126xf32>
    %57 = tpu.matmul %55, %56, %cst_64 {dimension_numbers = #tpu.dot_dimension_numbers<[1], [0], [0], [1], [0, 0, 1, 1], [], []>} : vector<16x16xf32>, vector<16x126xf32>, vector<16x126xf32> -> vector<16x126xf32>
    %58 = arith.addf %53, %57 : vector<16x126xf32>
    %c1_65 = arith.constant 1 : index
    %c0_66 = arith.constant 0 : index
    %c0_67 = arith.constant 0 : index
    %59 = vector.load %arg6[%c1_65, %c0_66, %c0_67] : memref<5x16x16xf32, #tpu.memory_space<vmem>>, vector<1x16x16xf32>
    %60 = vector.shape_cast %59 : vector<1x16x16xf32> to vector<16x16xf32>
    %c0_68 = arith.constant 0 : index
    %c1_69 = arith.constant 1 : index
    %61 = vector.load %arg13[%c0_68, %c1_69] : memref<16x132xf32, #tpu.memory_space<vmem>>, vector<16x126xf32>
    %cst_70 = arith.constant dense<0.000000e+00> : vector<16x126xf32>
    %62 = tpu.matmul %60, %61, %cst_70 {dimension_numbers = #tpu.dot_dimension_numbers<[1], [0], [0], [1], [0, 0, 1, 1], [], []>} : vector<16x16xf32>, vector<16x126xf32>, vector<16x126xf32> -> vector<16x126xf32>
    %63 = arith.addf %58, %62 : vector<16x126xf32>
    %c2_71 = arith.constant 2 : index
    %c0_72 = arith.constant 0 : index
    %c0_73 = arith.constant 0 : index
    %64 = vector.load %arg6[%c2_71, %c0_72, %c0_73] : memref<5x16x16xf32, #tpu.memory_space<vmem>>, vector<1x16x16xf32>
    %65 = vector.shape_cast %64 : vector<1x16x16xf32> to vector<16x16xf32>
    %c0_74 = arith.constant 0 : index
    %c2_75 = arith.constant 2 : index
    %66 = vector.load %arg13[%c0_74, %c2_75] : memref<16x132xf32, #tpu.memory_space<vmem>>, vector<16x126xf32>
    %cst_76 = arith.constant dense<0.000000e+00> : vector<16x126xf32>
    %67 = tpu.matmul %65, %66, %cst_76 {dimension_numbers = #tpu.dot_dimension_numbers<[1], [0], [0], [1], [0, 0, 1, 1], [], []>} : vector<16x16xf32>, vector<16x126xf32>, vector<16x126xf32> -> vector<16x126xf32>
    %68 = arith.addf %63, %67 : vector<16x126xf32>
    %c3 = arith.constant 3 : index
    %c0_77 = arith.constant 0 : index
    %c0_78 = arith.constant 0 : index
    %69 = vector.load %arg6[%c3, %c0_77, %c0_78] : memref<5x16x16xf32, #tpu.memory_space<vmem>>, vector<1x16x16xf32>
    %70 = vector.shape_cast %69 : vector<1x16x16xf32> to vector<16x16xf32>
    %c0_79 = arith.constant 0 : index
    %c3_80 = arith.constant 3 : index
    %71 = vector.load %arg13[%c0_79, %c3_80] : memref<16x132xf32, #tpu.memory_space<vmem>>, vector<16x126xf32>
    %cst_81 = arith.constant dense<0.000000e+00> : vector<16x126xf32>
    %72 = tpu.matmul %70, %71, %cst_81 {dimension_numbers = #tpu.dot_dimension_numbers<[1], [0], [0], [1], [0, 0, 1, 1], [], []>} : vector<16x16xf32>, vector<16x126xf32>, vector<16x126xf32> -> vector<16x126xf32>
    %73 = arith.addf %68, %72 : vector<16x126xf32>
    %c4 = arith.constant 4 : index
    %c0_82 = arith.constant 0 : index
    %c0_83 = arith.constant 0 : index
    %74 = vector.load %arg6[%c4, %c0_82, %c0_83] : memref<5x16x16xf32, #tpu.memory_space<vmem>>, vector<1x16x16xf32>
    %75 = vector.shape_cast %74 : vector<1x16x16xf32> to vector<16x16xf32>
    %c0_84 = arith.constant 0 : index
    %c4_85 = arith.constant 4 : index
    %76 = vector.load %arg13[%c0_84, %c4_85] : memref<16x132xf32, #tpu.memory_space<vmem>>, vector<16x126xf32>
    %cst_86 = arith.constant dense<0.000000e+00> : vector<16x126xf32>
    %77 = tpu.matmul %75, %76, %cst_86 {dimension_numbers = #tpu.dot_dimension_numbers<[1], [0], [0], [1], [0, 0, 1, 1], [], []>} : vector<16x16xf32>, vector<16x126xf32>, vector<16x126xf32> -> vector<16x126xf32>
    %78 = arith.addf %73, %77 : vector<16x126xf32>
    %c0_87 = arith.constant 0 : index
    %c0_88 = arith.constant 0 : index
    %79 = vector.load %arg7[%c0_87, %c0_88] : memref<16x1xf32, #tpu.memory_space<vmem>>, vector<16x1xf32>
    %80 = vector.broadcast %79 : vector<16x1xf32> to vector<16x126xf32>
    %81 = arith.addf %78, %80 : vector<16x126xf32>
    %cst_89 = arith.constant 0.000000e+00 : f32
    %82 = vector.broadcast %cst_89 : f32 to vector<16x126xf32>
    %83 = arith.maximumf %81, %82 : vector<16x126xf32>
    %cst_90 = arith.constant 0.000000e+00 : f32
    %84 = vector.broadcast %cst_90 : f32 to vector<16x132xf32>
    %c0_91 = arith.constant 0 : index
    %c0_92 = arith.constant 0 : index
    %85 = vector.load %arg13[%c0_91, %c0_92] : memref<16x132xf32, #tpu.memory_space<vmem>>, vector<16x132xf32>
    tpu.vector_store %arg13[%c0_91, %c0_92], %84 {strides = array<i32>} : memref<16x132xf32, #tpu.memory_space<vmem>>, vector<16x132xf32>,
    %c0_93 = arith.constant 0 : index
    %c0_94 = arith.constant 0 : index
    %86 = vector.load %arg13[%c0_93, %c0_94] : memref<16x132xf32, #tpu.memory_space<vmem>>, vector<16x126xf32>
    tpu.vector_store %arg13[%c0_93, %c0_94], %83 {strides = array<i32>} : memref<16x132xf32, #tpu.memory_space<vmem>>, vector<16x126xf32>,
    %c0_95 = arith.constant 0 : index
    %c1_96 = arith.constant 1 : index
    %87 = vector.load %arg13[%c0_95, %c1_96] : memref<16x132xf32, #tpu.memory_space<vmem>>, vector<16x126xf32>
    %88 = arith.maximumf %83, %87 : vector<16x126xf32>
    %c0_97 = arith.constant 0 : index
    %c0_98 = arith.constant 0 : index
    %89 = vector.load %arg9[%c0_97, %c0_98] : memref<1x100xf32, #tpu.memory_space<vmem>>, vector<1x100xf32>
    %90 = vector.extract_strided_slice %88 {offsets = [0, 0], sizes = [1, 126], strides = [1, 1]} : vector<16x126xf32> to vector<1x126xf32>
    %c0_99 = arith.constant 0 : index
    %c0_100 = arith.constant 0 : index
    %c0_101 = arith.constant 0 : index
    %91 = vector.load %arg8[%c0_99, %c0_100, %c0_101] : memref<16x126x100xf32, #tpu.memory_space<vmem>>, vector<1x126x100xf32>
    %92 = vector.shape_cast %91 : vector<1x126x100xf32> to vector<126x100xf32>
    %cst_102 = arith.constant dense<0.000000e+00> : vector<1x100xf32>
    %93 = tpu.matmul %90, %92, %cst_102 {dimension_numbers = #tpu.dot_dimension_numbers<[1], [0], [0], [1], [0, 0, 1, 1], [], []>} : vector<1x126xf32>, vector<126x100xf32>, vector<1x100xf32> -> vector<1x100xf32>
    %94 = arith.addf %89, %93 : vector<1x100xf32>
    %95 = vector.extract_strided_slice %88 {offsets = [1, 0], sizes = [1, 126], strides = [1, 1]} : vector<16x126xf32> to vector<1x126xf32>
    %c1_103 = arith.constant 1 : index
    %c0_104 = arith.constant 0 : index
    %c0_105 = arith.constant 0 : index
    %96 = vector.load %arg8[%c1_103, %c0_104, %c0_105] : memref<16x126x100xf32, #tpu.memory_space<vmem>>, vector<1x126x100xf32>
    %97 = vector.shape_cast %96 : vector<1x126x100xf32> to vector<126x100xf32>
    %cst_106 = arith.constant dense<0.000000e+00> : vector<1x100xf32>
    %98 = tpu.matmul %95, %97, %cst_106 {dimension_numbers = #tpu.dot_dimension_numbers<[1], [0], [0], [1], [0, 0, 1, 1], [], []>} : vector<1x126xf32>, vector<126x100xf32>, vector<1x100xf32> -> vector<1x100xf32>
    %99 = arith.addf %94, %98 : vector<1x100xf32>
    %100 = vector.extract_strided_slice %88 {offsets = [2, 0], sizes = [1, 126], strides = [1, 1]} : vector<16x126xf32> to vector<1x126xf32>
    %c2_107 = arith.constant 2 : index
    %c0_108 = arith.constant 0 : index
    %c0_109 = arith.constant 0 : index
    %101 = vector.load %arg8[%c2_107, %c0_108, %c0_109] : memref<16x126x100xf32, #tpu.memory_space<vmem>>, vector<1x126x100xf32>
    %102 = vector.shape_cast %101 : vector<1x126x100xf32> to vector<126x100xf32>
    %cst_110 = arith.constant dense<0.000000e+00> : vector<1x100xf32>
    %103 = tpu.matmul %100, %102, %cst_110 {dimension_numbers = #tpu.dot_dimension_numbers<[1], [0], [0], [1], [0, 0, 1, 1], [], []>} : vector<1x126xf32>, vector<126x100xf32>, vector<1x100xf32> -> vector<1x100xf32>
    %104 = arith.addf %99, %103 : vector<1x100xf32>
    %105 = vector.extract_strided_slice %88 {offsets = [3, 0], sizes = [1, 126], strides = [1, 1]} : vector<16x126xf32> to vector<1x126xf32>
    %c3_111 = arith.constant 3 : index
    %c0_112 = arith.constant 0 : index
    %c0_113 = arith.constant 0 : index
    %106 = vector.load %arg8[%c3_111, %c0_112, %c0_113] : memref<16x126x100xf32, #tpu.memory_space<vmem>>, vector<1x126x100xf32>
    %107 = vector.shape_cast %106 : vector<1x126x100xf32> to vector<126x100xf32>
    %cst_114 = arith.constant dense<0.000000e+00> : vector<1x100xf32>
    %108 = tpu.matmul %105, %107, %cst_114 {dimension_numbers = #tpu.dot_dimension_numbers<[1], [0], [0], [1], [0, 0, 1, 1], [], []>} : vector<1x126xf32>, vector<126x100xf32>, vector<1x100xf32> -> vector<1x100xf32>
    %109 = arith.addf %104, %108 : vector<1x100xf32>
    %110 = vector.extract_strided_slice %88 {offsets = [4, 0], sizes = [1, 126], strides = [1, 1]} : vector<16x126xf32> to vector<1x126xf32>
    %c4_115 = arith.constant 4 : index
    %c0_116 = arith.constant 0 : index
    %c0_117 = arith.constant 0 : index
    %111 = vector.load %arg8[%c4_115, %c0_116, %c0_117] : memref<16x126x100xf32, #tpu.memory_space<vmem>>, vector<1x126x100xf32>
    %112 = vector.shape_cast %111 : vector<1x126x100xf32> to vector<126x100xf32>
    %cst_118 = arith.constant dense<0.000000e+00> : vector<1x100xf32>
    %113 = tpu.matmul %110, %112, %cst_118 {dimension_numbers = #tpu.dot_dimension_numbers<[1], [0], [0], [1], [0, 0, 1, 1], [], []>} : vector<1x126xf32>, vector<126x100xf32>, vector<1x100xf32> -> vector<1x100xf32>
    %114 = arith.addf %109, %113 : vector<1x100xf32>
    %115 = vector.extract_strided_slice %88 {offsets = [5, 0], sizes = [1, 126], strides = [1, 1]} : vector<16x126xf32> to vector<1x126xf32>
    %c5 = arith.constant 5 : index
    %c0_119 = arith.constant 0 : index
    %c0_120 = arith.constant 0 : index
    %116 = vector.load %arg8[%c5, %c0_119, %c0_120] : memref<16x126x100xf32, #tpu.memory_space<vmem>>, vector<1x126x100xf32>
    %117 = vector.shape_cast %116 : vector<1x126x100xf32> to vector<126x100xf32>
    %cst_121 = arith.constant dense<0.000000e+00> : vector<1x100xf32>
    %118 = tpu.matmul %115, %117, %cst_121 {dimension_numbers = #tpu.dot_dimension_numbers<[1], [0], [0], [1], [0, 0, 1, 1], [], []>} : vector<1x126xf32>, vector<126x100xf32>, vector<1x100xf32> -> vector<1x100xf32>
    %119 = arith.addf %114, %118 : vector<1x100xf32>
    %120 = vector.extract_strided_slice %88 {offsets = [6, 0], sizes = [1, 126], strides = [1, 1]} : vector<16x126xf32> to vector<1x126xf32>
    %c6 = arith.constant 6 : index
    %c0_122 = arith.constant 0 : index
    %c0_123 = arith.constant 0 : index
    %121 = vector.load %arg8[%c6, %c0_122, %c0_123] : memref<16x126x100xf32, #tpu.memory_space<vmem>>, vector<1x126x100xf32>
    %122 = vector.shape_cast %121 : vector<1x126x100xf32> to vector<126x100xf32>
    %cst_124 = arith.constant dense<0.000000e+00> : vector<1x100xf32>
    %123 = tpu.matmul %120, %122, %cst_124 {dimension_numbers = #tpu.dot_dimension_numbers<[1], [0], [0], [1], [0, 0, 1, 1], [], []>} : vector<1x126xf32>, vector<126x100xf32>, vector<1x100xf32> -> vector<1x100xf32>
    %124 = arith.addf %119, %123 : vector<1x100xf32>
    %125 = vector.extract_strided_slice %88 {offsets = [7, 0], sizes = [1, 126], strides = [1, 1]} : vector<16x126xf32> to vector<1x126xf32>
    %c7 = arith.constant 7 : index
    %c0_125 = arith.constant 0 : index
    %c0_126 = arith.constant 0 : index
    %126 = vector.load %arg8[%c7, %c0_125, %c0_126] : memref<16x126x100xf32, #tpu.memory_space<vmem>>, vector<1x126x100xf32>
    %127 = vector.shape_cast %126 : vector<1x126x100xf32> to vector<126x100xf32>
    %cst_127 = arith.constant dense<0.000000e+00> : vector<1x100xf32>
    %128 = tpu.matmul %125, %127, %cst_127 {dimension_numbers = #tpu.dot_dimension_numbers<[1], [0], [0], [1], [0, 0, 1, 1], [], []>} : vector<1x126xf32>, vector<126x100xf32>, vector<1x100xf32> -> vector<1x100xf32>
    %129 = arith.addf %124, %128 : vector<1x100xf32>
    %130 = vector.extract_strided_slice %88 {offsets = [8, 0], sizes = [1, 126], strides = [1, 1]} : vector<16x126xf32> to vector<1x126xf32>
    %c8 = arith.constant 8 : index
    %c0_128 = arith.constant 0 : index
    %c0_129 = arith.constant 0 : index
    %131 = vector.load %arg8[%c8, %c0_128, %c0_129] : memref<16x126x100xf32, #tpu.memory_space<vmem>>, vector<1x126x100xf32>
    %132 = vector.shape_cast %131 : vector<1x126x100xf32> to vector<126x100xf32>
    %cst_130 = arith.constant dense<0.000000e+00> : vector<1x100xf32>
    %133 = tpu.matmul %130, %132, %cst_130 {dimension_numbers = #tpu.dot_dimension_numbers<[1], [0], [0], [1], [0, 0, 1, 1], [], []>} : vector<1x126xf32>, vector<126x100xf32>, vector<1x100xf32> -> vector<1x100xf32>
    %134 = arith.addf %129, %133 : vector<1x100xf32>
    %135 = vector.extract_strided_slice %88 {offsets = [9, 0], sizes = [1, 126], strides = [1, 1]} : vector<16x126xf32> to vector<1x126xf32>
    %c9 = arith.constant 9 : index
    %c0_131 = arith.constant 0 : index
    %c0_132 = arith.constant 0 : index
    %136 = vector.load %arg8[%c9, %c0_131, %c0_132] : memref<16x126x100xf32, #tpu.memory_space<vmem>>, vector<1x126x100xf32>
    %137 = vector.shape_cast %136 : vector<1x126x100xf32> to vector<126x100xf32>
    %cst_133 = arith.constant dense<0.000000e+00> : vector<1x100xf32>
    %138 = tpu.matmul %135, %137, %cst_133 {dimension_numbers = #tpu.dot_dimension_numbers<[1], [0], [0], [1], [0, 0, 1, 1], [], []>} : vector<1x126xf32>, vector<126x100xf32>, vector<1x100xf32> -> vector<1x100xf32>
    %139 = arith.addf %134, %138 : vector<1x100xf32>
    %140 = vector.extract_strided_slice %88 {offsets = [10, 0], sizes = [1, 126], strides = [1, 1]} : vector<16x126xf32> to vector<1x126xf32>
    %c10 = arith.constant 10 : index
    %c0_134 = arith.constant 0 : index
    %c0_135 = arith.constant 0 : index
    %141 = vector.load %arg8[%c10, %c0_134, %c0_135] : memref<16x126x100xf32, #tpu.memory_space<vmem>>, vector<1x126x100xf32>
    %142 = vector.shape_cast %141 : vector<1x126x100xf32> to vector<126x100xf32>
    %cst_136 = arith.constant dense<0.000000e+00> : vector<1x100xf32>
    %143 = tpu.matmul %140, %142, %cst_136 {dimension_numbers = #tpu.dot_dimension_numbers<[1], [0], [0], [1], [0, 0, 1, 1], [], []>} : vector<1x126xf32>, vector<126x100xf32>, vector<1x100xf32> -> vector<1x100xf32>
    %144 = arith.addf %139, %143 : vector<1x100xf32>
    %145 = vector.extract_strided_slice %88 {offsets = [11, 0], sizes = [1, 126], strides = [1, 1]} : vector<16x126xf32> to vector<1x126xf32>
    %c11 = arith.constant 11 : index
    %c0_137 = arith.constant 0 : index
    %c0_138 = arith.constant 0 : index
    %146 = vector.load %arg8[%c11, %c0_137, %c0_138] : memref<16x126x100xf32, #tpu.memory_space<vmem>>, vector<1x126x100xf32>
    %147 = vector.shape_cast %146 : vector<1x126x100xf32> to vector<126x100xf32>
    %cst_139 = arith.constant dense<0.000000e+00> : vector<1x100xf32>
    %148 = tpu.matmul %145, %147, %cst_139 {dimension_numbers = #tpu.dot_dimension_numbers<[1], [0], [0], [1], [0, 0, 1, 1], [], []>} : vector<1x126xf32>, vector<126x100xf32>, vector<1x100xf32> -> vector<1x100xf32>
    %149 = arith.addf %144, %148 : vector<1x100xf32>
    %150 = vector.extract_strided_slice %88 {offsets = [12, 0], sizes = [1, 126], strides = [1, 1]} : vector<16x126xf32> to vector<1x126xf32>
    %c12 = arith.constant 12 : index
    %c0_140 = arith.constant 0 : index
    %c0_141 = arith.constant 0 : index
    %151 = vector.load %arg8[%c12, %c0_140, %c0_141] : memref<16x126x100xf32, #tpu.memory_space<vmem>>, vector<1x126x100xf32>
    %152 = vector.shape_cast %151 : vector<1x126x100xf32> to vector<126x100xf32>
    %cst_142 = arith.constant dense<0.000000e+00> : vector<1x100xf32>
    %153 = tpu.matmul %150, %152, %cst_142 {dimension_numbers = #tpu.dot_dimension_numbers<[1], [0], [0], [1], [0, 0, 1, 1], [], []>} : vector<1x126xf32>, vector<126x100xf32>, vector<1x100xf32> -> vector<1x100xf32>
    %154 = arith.addf %149, %153 : vector<1x100xf32>
    %155 = vector.extract_strided_slice %88 {offsets = [13, 0], sizes = [1, 126], strides = [1, 1]} : vector<16x126xf32> to vector<1x126xf32>
    %c13 = arith.constant 13 : index
    %c0_143 = arith.constant 0 : index
    %c0_144 = arith.constant 0 : index
    %156 = vector.load %arg8[%c13, %c0_143, %c0_144] : memref<16x126x100xf32, #tpu.memory_space<vmem>>, vector<1x126x100xf32>
    %157 = vector.shape_cast %156 : vector<1x126x100xf32> to vector<126x100xf32>
    %cst_145 = arith.constant dense<0.000000e+00> : vector<1x100xf32>
    %158 = tpu.matmul %155, %157, %cst_145 {dimension_numbers = #tpu.dot_dimension_numbers<[1], [0], [0], [1], [0, 0, 1, 1], [], []>} : vector<1x126xf32>, vector<126x100xf32>, vector<1x100xf32> -> vector<1x100xf32>
    %159 = arith.addf %154, %158 : vector<1x100xf32>
    %160 = vector.extract_strided_slice %88 {offsets = [14, 0], sizes = [1, 126], strides = [1, 1]} : vector<16x126xf32> to vector<1x126xf32>
    %c14 = arith.constant 14 : index
    %c0_146 = arith.constant 0 : index
    %c0_147 = arith.constant 0 : index
    %161 = vector.load %arg8[%c14, %c0_146, %c0_147] : memref<16x126x100xf32, #tpu.memory_space<vmem>>, vector<1x126x100xf32>
    %162 = vector.shape_cast %161 : vector<1x126x100xf32> to vector<126x100xf32>
    %cst_148 = arith.constant dense<0.000000e+00> : vector<1x100xf32>
    %163 = tpu.matmul %160, %162, %cst_148 {dimension_numbers = #tpu.dot_dimension_numbers<[1], [0], [0], [1], [0, 0, 1, 1], [], []>} : vector<1x126xf32>, vector<126x100xf32>, vector<1x100xf32> -> vector<1x100xf32>
    %164 = arith.addf %159, %163 : vector<1x100xf32>
    %165 = vector.extract_strided_slice %88 {offsets = [15, 0], sizes = [1, 126], strides = [1, 1]} : vector<16x126xf32> to vector<1x126xf32>
    %c15 = arith.constant 15 : index
    %c0_149 = arith.constant 0 : index
    %c0_150 = arith.constant 0 : index
    %166 = vector.load %arg8[%c15, %c0_149, %c0_150] : memref<16x126x100xf32, #tpu.memory_space<vmem>>, vector<1x126x100xf32>
    %167 = vector.shape_cast %166 : vector<1x126x100xf32> to vector<126x100xf32>
    %cst_151 = arith.constant dense<0.000000e+00> : vector<1x100xf32>
    %168 = tpu.matmul %165, %167, %cst_151 {dimension_numbers = #tpu.dot_dimension_numbers<[1], [0], [0], [1], [0, 0, 1, 1], [], []>} : vector<1x126xf32>, vector<126x100xf32>, vector<1x100xf32> -> vector<1x100xf32>
    %169 = arith.addf %164, %168 : vector<1x100xf32>
    %cst_152 = arith.constant 0.000000e+00 : f32
    %170 = vector.broadcast %cst_152 : f32 to vector<1x100xf32>
    %171 = arith.maximumf %169, %170 : vector<1x100xf32>
    %c0_153 = arith.constant 0 : index
    %c0_154 = arith.constant 0 : index
    %172 = vector.load %arg10[%c0_153, %c0_154] : memref<100x10xf32, #tpu.memory_space<vmem>>, vector<100x10xf32>
    %cst_155 = arith.constant dense<0.000000e+00> : vector<1x10xf32>
    %173 = tpu.matmul %171, %172, %cst_155 {dimension_numbers = #tpu.dot_dimension_numbers<[1], [0], [0], [1], [0, 0, 1, 1], [], []>} : vector<1x100xf32>, vector<100x10xf32>, vector<1x10xf32> -> vector<1x10xf32>
    %c0_156 = arith.constant 0 : index
    %c0_157 = arith.constant 0 : index
    %174 = vector.load %arg11[%c0_156, %c0_157] : memref<1x10xf32, #tpu.memory_space<vmem>>, vector<1x10xf32>
    %175 = arith.addf %173, %174 : vector<1x10xf32>
    %c0_158 = arith.constant 0 : index
    %c0_159 = arith.constant 0 : index
    %c0_160 = arith.constant 0 : index
    %176 = vector.load %arg12[%c0_158, %c0_159, %c0_160] : memref<1x1x10xf32, #tpu.memory_space<vmem>>, vector<1x1x10xf32>
    %177 = vector.shape_cast %176 : vector<1x1x10xf32> to vector<1x10xf32>
    %178 = vector.shape_cast %175 : vector<1x10xf32> to vector<1x1x10xf32>
    tpu.vector_store %arg12[%c0_158, %c0_159, %c0_160], %178 {strides = array<i32>} : memref<1x1x10xf32, #tpu.memory_space<vmem>>, vector<1x1x10xf32>,
    return
  }
  func.func @transform_0(%arg0: i32) -> (i32, i32, i32) {
    %c0_i32 = arith.constant 0 : i32
    %c0_i32_0 = arith.constant 0 : i32
    %c0_i32_1 = arith.constant 0 : i32
    return %arg0, %c0_i32, %c0_i32_0 : i32, i32, i32
  }
  func.func @transform_1(%arg0: i32) -> (i32, i32, i32) {
    %c0_i32 = arith.constant 0 : i32
    %c0_i32_0 = arith.constant 0 : i32
    %c0_i32_1 = arith.constant 0 : i32
    %c0_i32_2 = arith.constant 0 : i32
    return %c0_i32, %c0_i32_0, %c0_i32_1 : i32, i32, i32
  }
  func.func @transform_2(%arg0: i32) -> (i32, i32) {
    %c0_i32 = arith.constant 0 : i32
    %c0_i32_0 = arith.constant 0 : i32
    %c0_i32_1 = arith.constant 0 : i32
    return %c0_i32, %c0_i32_0 : i32, i32
  }
  func.func @transform_3(%arg0: i32) -> (i32, i32, i32) {
    %c0_i32 = arith.constant 0 : i32
    %c0_i32_0 = arith.constant 0 : i32
    %c0_i32_1 = arith.constant 0 : i32
    %c0_i32_2 = arith.constant 0 : i32
    return %c0_i32, %c0_i32_0, %c0_i32_1 : i32, i32, i32
  }
  func.func @transform_4(%arg0: i32) -> (i32, i32) {
    %c0_i32 = arith.constant 0 : i32
    %c0_i32_0 = arith.constant 0 : i32
    %c0_i32_1 = arith.constant 0 : i32
    return %c0_i32, %c0_i32_0 : i32, i32
  }
  func.func @transform_5(%arg0: i32) -> (i32, i32, i32) {
    %c0_i32 = arith.constant 0 : i32
    %c0_i32_0 = arith.constant 0 : i32
    %c0_i32_1 = arith.constant 0 : i32
    %c0_i32_2 = arith.constant 0 : i32
    return %c0_i32, %c0_i32_0, %c0_i32_1 : i32, i32, i32
  }
  func.func @transform_6(%arg0: i32) -> (i32, i32) {
    %c0_i32 = arith.constant 0 : i32
    %c0_i32_0 = arith.constant 0 : i32
    %c0_i32_1 = arith.constant 0 : i32
    return %c0_i32, %c0_i32_0 : i32, i32
  }
  func.func @transform_7(%arg0: i32) -> (i32, i32, i32) {
    %c0_i32 = arith.constant 0 : i32
    %c0_i32_0 = arith.constant 0 : i32
    %c0_i32_1 = arith.constant 0 : i32
    %c0_i32_2 = arith.constant 0 : i32
    return %c0_i32, %c0_i32_0, %c0_i32_1 : i32, i32, i32
  }
  func.func @transform_8(%arg0: i32) -> (i32, i32) {
    %c0_i32 = arith.constant 0 : i32
    %c0_i32_0 = arith.constant 0 : i32
    %c0_i32_1 = arith.constant 0 : i32
    return %c0_i32, %c0_i32_0 : i32, i32
  }
  func.func @transform_9(%arg0: i32) -> (i32, i32) {
    %c0_i32 = arith.constant 0 : i32
    %c0_i32_0 = arith.constant 0 : i32
    %c0_i32_1 = arith.constant 0 : i32
    return %c0_i32, %c0_i32_0 : i32, i32
  }
  func.func @transform_10(%arg0: i32) -> (i32, i32) {
    %c0_i32 = arith.constant 0 : i32
    %c0_i32_0 = arith.constant 0 : i32
    %c0_i32_1 = arith.constant 0 : i32
    return %c0_i32, %c0_i32_0 : i32, i32
  }
  func.func @transform_11(%arg0: i32) -> (i32, i32, i32) {
    %c0_i32 = arith.constant 0 : i32
    %c0_i32_0 = arith.constant 0 : i32
    %c0_i32_1 = arith.constant 0 : i32
    return %arg0, %c0_i32, %c0_i32_0 : i32, i32, i32
  }
}

</mosaic_0001>

<bundles_post_ra>
// kernel: cnn1_forward.1
= control target key start
LH: loop header
LB: loop body
LE: loop exit
PB: predicated region body
PF: predicated region fallthrough
CT: control target
= control target key end

     0   :  { %s6139_s0 = inlined_call_operand.vmem [shape: f32[2,6,128], index: 0, kind: input, shape index: {}]   ;;  %s6140_s1 = inlined_call_operand.vmem [shape: f32[3,16,6], index: 1, kind: input, shape index: {}]   ;;  %s6141_s2 = inlined_call_operand.vmem [shape: f32[16,1], index: 2, kind: input, shape index: {}]   ;;  %s6142_s3 = inlined_call_operand.vmem [shape: f32[3,16,16], index: 3, kind: input, shape index: {}]   ;;  %s6143_s4 = inlined_call_operand.vmem [shape: f32[16,1], index: 4, kind: input, shape index: {}]   ;;  %s6144_s5 = inlined_call_operand.vmem [shape: f32[5,16,16], index: 5, kind: input, shape index: {}]   ;;  %s6145_s6 = inlined_call_operand.vmem [shape: f32[16,1], index: 6, kind: input, shape index: {}]   ;;  %s6146_s7 = inlined_call_operand.vmem [shape: f32[16,126,100], index: 7, kind: input, shape index: {}]   ;;  %s6147_s8 = inlined_call_operand.vmem [shape: f32[1,100], index: 8, kind: input, shape index: {}]   ;;  %s6148_s9 = inlined_call_operand.vmem [shape: f32[100,10], index: 9, kind: input, shape index: {}]   ;;  %s6149_s10 = inlined_call_operand.vmem [shape: f32[1,10], index: 10, kind: input, shape index: {}]   ;;  %s6150_s11 = inlined_call_operand.hbm [shape: f32[2,1,10], index: 11, kind: output, shape index: {}]  }
   0x1   :  { %6151 = sst [smem:[#allocation6_spill]] %s6139_s0 }
   0x2   :  { %16 = vsyncpa [#allocation4], 0 }
   0x3   :  { %18 = vsyncpa [#allocation4 + $0x1], 0  ;;  %s4690_s17 = smov 0   ;;  %s4692_s18 = smov 0  }
   0x4   :  { %s4694_s19 = smov 0   ;;  %s4696_s20 = smov 0  }
   0x5 LB: > { %s4711_s21 = sadd.s32 4294967295, %s4619_s20   ;;  %s3200_s22 = sadd.s32 4294967294, %s4619_s20   ;;  %s4619_s20 = sphi %s4696_s20, %s6158_s20   ;;  %s4615_s19 = sphi %s4694_s19, %s6157_s19   ;;  %s4611_s18 = sphi %s4692_s18, %s6156_s18   ;;  %s4607_s17 = sphi %s4690_s17, %s6155_s17  }
   0x6   : > { %s4715_s23 = sadd.s32 1, %s4619_s20   ;;  %s267_s24 = sadd.s32 1, %s4615_s19 }
   0x7   : > { %s264_s25 = ssub.s32 %s4619_s20, %s4715_s23  ;;  %p277_p0 = scmp.ne.s32.totalorder %s4615_s19, %s4611_s18 }
   0x8   : > { %p265_p1 = scmp.eq.s32.totalorder %s264_s25, 0  ;;  %p278_p2 = scmp.eq.s32.totalorder %s4711_s21, 1 }
   0x9   : > { %p283_p3 = scmp.ne.s32.totalorder %s4611_s18, %s4607_s17  ;;  %p284_p4 = scmp.eq.s32.totalorder %s3200_s22, 1 }
   0xa   : > { %s4726_s26 = scalar_select %p265_p1, %s4615_s19, %s267_s24  }
   0xb   : > { %p4728_p5 = por %p278_p2, %p277_p0  ;;  %p4732_p6 = por %p284_p4, %p283_p3 }
   0xc   : > { %p3203_p7 = scmp.ge.s32.totalorder %s4619_s20, 1  ;;  %p339_p8 = scmp.lt.s32.totalorder %s4619_s20, 3 }
   0xe   : > { %p340_p9 = pnand %p3203_p7, %p339_p8 }
   0xf   : > { %p377_p10 = scmp.lt.s32.totalorder (!%p340_p9), %s4711_s21, 1  ;;  %s6154_s0 = sld [smem:[#allocation6_spill]] (!%p340_p9) }
  0x10   : > { %343 = sbr.rel (%p340_p9) target bundleno = 2159 (0x86f), region = 64  ;;  %s4622_s15 = smov (!%p340_p9), 1  }
  0x11   : > { %s4624_s24 = smov (!%p340_p9), 127   ;;  %s4625_s25 = smov (!%p340_p9), 126  }
  0x12   : > { %s3520_s12 = sshll.u32 (!%p340_p9), %s4711_s21, 4 }
  0x15   : > { %vm383_vm0 = vcmask 31744   ;;  %v4621_v0 = vmov 0.0   ;;  %s378_s29 = scalar_select %p377_p10, %s4711_s21, 1  ;;  %v3205_v2 = vld [vmem:[%s6140_s1 + $0x10] sm:$0xff]  ;;  %vm410_vm1 = vcmask 48128   ;;  %vm391_vm2 = vcmask 1045512  }
  0x16   : > { %382 = vst [vmem:[#allocation2] sm:$0xff] %v4621_v0  ;;  %384 = vst.msk [vmem:[#allocation2 + $0x8] sm:$0xff] %vm383_vm0, %v4621_v0  ;;  %vm393_vm3 = vcmask 5120   ;;  %3852 = vmatprep.mubr.msk.f32.mxu0 %vm410_vm1, %v3205_v2  ;;  %v4623_v6 = vmov 0   ;;  %v673_v7 = vld [vmem:[%s6141_s2 + $0x8] sm:$0xff]  ;;  %v672_v8 = vld [vmem:[%s6141_s2] sm:$0xff] }
  0x17   : > { %386 = vst.msk [vmem:[#allocation2 + $0x18] sm:$0xff] %vm383_vm0, %v4621_v0  ;;  %690 = vst [vmem:[#allocation2 + $0x10] sm:$0xff] %v4621_v0  ;;  %s3204_s30 = sshll.u32 %s378_s29, 3  ;;  %4557 = vset.pattern.permute.xlu1 %v4623_v6  ;;  %4558 = vset.pattern.permute.xlu0 %v4623_v6  ;;  %vm408_vm4 = vcmask 1039360   ;;  %vm417_vm5 = vcmask 1045504   ;;  %v3206_v12 = vld [vmem:[%s6140_s1 + $0x18] sm:$0xff]  ;;  %s6104_s29 = scalar_lea.hbm %s6150_s11, %s3520_s12 }
  0x18   : > { %691 = vst.msk [vmem:[#allocation2 + $0x18] sm:$0xff] %vm383_vm0, %v4621_v0  ;;  %s380_s14 = scalar_lea.vmem %s6154_s0, %s3204_s30  ;;  %vm585_vm6 = vcmask 1031168   ;;  %v395_v13 = vld [vmem:[%s6140_s1] sm:$0xff]  ;;  %v396_v17 = vld [vmem:[%s6140_s1 + $0x8] sm:$0xff]  ;;  %vm700_vm7 = vcmask 1047560   ;;  %vm702_vm8 = vcmask 7168  }
  0x19   : > { %v381_v1 = vld [vmem:[%s380_s14] sm:$0x3f]  ;;  %v3214_v19 = vld [vmem:[%s6140_s1 + $0x28] sm:$0xff]  ;;  %v3218_v37 = vld [vmem:[%s6142_s3 + $0x10] sm:$0xff]  ;;  %vm731_vm9 = vcmask 130048   ;;  %s4627_s30 = smov 124  }
  0x1a   : > { %388 = vrot.lane.b32.xlu0 %v381_v1, %s4622_s15  ;;  %v3213_v18 = vld [vmem:[%s6140_s1 + $0x20] sm:$0xff]  ;;  %v993_v44 = vld [vmem:[%s6143_s4 + $0x8] sm:$0xff]  ;;  %v3219_v51 = vld [vmem:[%s6142_s3 + $0x18] sm:$0xff]  ;;  %vm1312_vm10 = vcmask 1022976   ;;  %vm1411_vm11 = vcmask 1014784   ;;  %vm4628_vm12 = vmmov 0  }
  0x1b   : > { %v992_v43 = vld [vmem:[%s6143_s4] sm:$0xff]  ;;  %v707_v55 = vld [vmem:[%s6142_s3 + $0x8] sm:$0xff]  ;;  %vm3056_vm13 = vcmask 1043456   ;;  %vm3052_vm14 = vcmask 818176   ;;  %vm3130_vm15 = vcmask 73728   ;;  %s4629_s21 = smov [#allocation3]  }
  0x1c   : > { %v706_v52 = vld [vmem:[%s6142_s3] sm:$0xff]  ;;  %v3225_v61 = vld [vmem:[%s6142_s3 + $0x28] sm:$0xff] }
  0x1d   : > { %v3224_v56 = vld [vmem:[%s6142_s3 + $0x20] sm:$0xff] }
  0x8c   : > { %v389_v3 = vpop.permute.xlu0 %388 }
  0x8d   : > { %392 = vst.msk [vmem:[#allocation2] sm:$0x3f] %vm391_vm2, %v389_v3 }
  0x8e   : > { %394 = vst.msk [vmem:[#allocation2 + $0x8] sm:$0x3f] %vm393_vm3, %v389_v3 }
  0x94   : > { %v397_v5 = vld [vmem:[#allocation2] sm:$0x3f] }
  0x95   : > { %v401_v4 = vld [vmem:[#allocation2 + $0x8] sm:$0x3f]  ;;  %404 = vrot.lane.b32.xlu0 %v397_v5, %s4624_s24  ;;  %688 = vst [vmem:[#allocation2] sm:$0xff] %v4621_v0 }
  0x96   : > { %406 = vrot.lane.b32.xlu1 %v401_v4, %s4624_s24  ;;  %689 = vst.msk [vmem:[#allocation2 + $0x8] sm:$0xff] %vm383_vm0, %v4621_v0 }
  0x99   : > { %583 = vrot.lane.b32.xlu0 %v401_v4, %s4625_s25 }
  0x9a   : > { %581 = vrot.lane.b32.xlu1 %v397_v5, %s4625_s25 }
  0x9d   : > { %676 = vperm.xlu0 %4558, %v672_v8  }
  0x9e   : > { %681 = vperm.xlu1 %4557, %v673_v7  }
 0x107   : > { %v405_v10 = vpop.permute.xlu0 %404 }
 0x108   : > { %v407_v9 = vpop.permute.xlu1 %406 }
 0x109   : > { %v409_v11 = vsel %vm408_vm4, %v405_v10, %v407_v9 }
 0x10a   : > { %3850 = vmatprep.subr.msk.mxu0 %vm417_vm5, %v409_v11 }
 0x10b   : > { %3851 = vmatpush3.msk.msra.mxu0 %vm417_vm5, %v409_v11  ;;  %v584_v15 = vpop.permute.xlu0 %583 }
 0x10c   : > { %v582_v14 = vpop.permute.xlu1 %581  ;;  %3853 = vmatmul.mubr.msk.f32.vlgmr.msra.gmra.mxu0 %vm410_vm1, %v3206_v12  ;;  %3855 = vmatprep.subr.msk.mxu0 %vm417_vm5, %v397_v5 }
 0x10d   : > { %v586_v16 = vsel %vm585_vm6, %v582_v14, %v584_v15  ;;  %3856 = vmatpush3.msk.msra.mxu0 %vm417_vm5, %v397_v5  ;;  %3857 = vmatprep.mubr.msk.f32.mxu0 %vm410_vm1, %v395_v13 }
 0x10e   : > { %3860 = vmatprep.subr.msk.mxu0 %vm417_vm5, %v586_v16 }
 0x110   : > { %3858 = vmatmul.mubr.msk.f32.vlgmr.msra.gmra.mxu0 %vm410_vm1, %v396_v17  ;;  %v1024_v17 = vld [vmem:[%s6144_s5] sm:$0xff] }
 0x111   : > { %3861 = vmatpush3.msk.msra.mxu0 %vm417_vm5, %v586_v16  ;;  %3862 = vmatprep.mubr.msk.f32.mxu0 %vm410_vm1, %v3213_v18  ;;  %v3228_v18 = vld [vmem:[%s6144_s5 + $0x10] sm:$0xff] }
 0x112   : > { %3897 = vmatprep.mubr.msk.f32.mxu1 %vm731_vm9, %v1024_v17 }
 0x114   : > { %3863 = vmatmul.mubr.msk.f32.vlgmr.msra.gmra.mxu0 %vm410_vm1, %v3214_v19 }
 0x115   : > { %3869 = vmatprep.mubr.msk.f32.mxu0 %vm731_vm9, %v3218_v37 }
 0x118   : > { %v677_v30 = vpop.permute.xlu0 %676 }
 0x119   : > { %v682_v26 = vpop.permute.xlu1 %681 }
 0x1cc   : > { %v3854_v20 = vpop.f32.mrf.mxu0 }
 0x1ce   : > { %v486_v21 = vpop.f32.mrf.mxu0 }
 0x1d0   : > { %v3859_v22 = vpop.f32.mrf.mxu0 }
 0x1d1   : > { %v575_v24 = vadd.f32 %v3859_v22, %v3854_v20 }
 0x1d2   : > { %v569_v23 = vpop.f32.mrf.mxu0 }
 0x1d3   : > { %v570_v27 = vadd.f32 %v569_v23, %v486_v21  ;;  %v1025_v23 = vld [vmem:[%s6144_s5 + $0x8] sm:$0xff] }
 0x1d4   : > { %v3864_v25 = vpop.f32.mrf.mxu0 }
 0x1d5   : > { %v671_v28 = vadd.f32 %v3864_v25, %v575_v24  ;;  %v3238_v24 = vld [vmem:[%s6144_s5 + $0x30] sm:$0xff]  ;;  %v1499_v25 = vld [vmem:[%s6145_s6] sm:$0xff] }
 0x1d6   : > { %v661_v29 = vpop.f32.mrf.mxu0 }
 0x1d7   : > { %v685_v31 = vadd.f32 %v682_v26, %v671_v28  ;;  %v670_v32 = vadd.f32 %v661_v29, %v570_v27  ;;  %v1500_v26 = vld [vmem:[%s6145_s6 + $0x8] sm:$0xff] }
 0x1d9   : > { %v687_v33 = vmax.f32 %v685_v31, 0.0  ;;  %v684_v34 = vadd.f32 %v677_v30, %v670_v32 }
 0x1db   : > { %696 = vrot.lane.b32.xlu1 %v687_v33, %s4622_s15  ;;  %v686_v35 = vmax.f32 %v684_v34, 0.0  ;;  %v3229_v33 = vld [vmem:[%s6144_s5 + $0x18] sm:$0xff] }
 0x1df   : > { %694 = vrot.lane.b32.xlu1 %v686_v35, %s4622_s15  ;;  %v3234_v35 = vld [vmem:[%s6144_s5 + $0x20] sm:$0xff] }
 0x24d   : > { %v697_v36 = vpop.permute.xlu1 %696 }
 0x24e   : > { %704 = vst.msk [vmem:[#allocation2 + $0x10] sm:$0xff] %vm700_vm7, %v697_v36 }
 0x24f   : > { %705 = vst.msk [vmem:[#allocation2 + $0x18] sm:$0xff] %vm702_vm8, %v697_v36 }
 0x251   : > { %v695_v38 = vpop.permute.xlu1 %694 }
 0x252   : > { %701 = vst.msk [vmem:[#allocation2] sm:$0xff] %vm700_vm7, %v695_v38 }
 0x253   : > { %703 = vst.msk [vmem:[#allocation2 + $0x8] sm:$0xff] %vm702_vm8, %v695_v38  ;;  %v3235_v38 = vld [vmem:[%s6144_s5 + $0x28] sm:$0xff] }
 0x255   : > { %v709_v39 = vld [vmem:[#allocation2 + $0x10] sm:$0xff] }
 0x256   : > { %v714_v40 = vld [vmem:[#allocation2 + $0x18] sm:$0xff]  ;;  %723 = vrot.lane.b32.xlu0 %v709_v39, %s4624_s24  ;;  %1010 = vst [vmem:[#allocation2 + $0x10] sm:$0xff] %v4621_v0 }
 0x257   : > { %725 = vrot.lane.b32.xlu1 %v714_v40, %s4624_s24  ;;  %1011 = vst.msk [vmem:[#allocation2 + $0x18] sm:$0xff] %vm383_vm0, %v4621_v0 }
 0x259   : > { %v708_v42 = vld [vmem:[#allocation2] sm:$0xff] }
 0x25a   : > { %v713_v41 = vld [vmem:[#allocation2 + $0x8] sm:$0xff]  ;;  %719 = vrot.lane.b32.xlu0 %v708_v42, %s4624_s24  ;;  %1008 = vst [vmem:[#allocation2] sm:$0xff] %v4621_v0 }
 0x25b   : > { %721 = vrot.lane.b32.xlu1 %v713_v41, %s4624_s24  ;;  %1009 = vst.msk [vmem:[#allocation2 + $0x8] sm:$0xff] %vm383_vm0, %v4621_v0 }
 0x25e   : > { %901 = vrot.lane.b32.xlu0 %v709_v39, %s4625_s25 }
 0x25f   : > { %903 = vrot.lane.b32.xlu1 %v714_v40, %s4625_s25  ;;  %v3242_v40 = vld [vmem:[%s6144_s5 + $0x40] sm:$0xff] }
 0x262   : > { %897 = vrot.lane.b32.xlu0 %v708_v42, %s4625_s25 }
 0x263   : > { %899 = vrot.lane.b32.xlu1 %v713_v41, %s4625_s25 }
 0x266   : > { %1001 = vperm.xlu0 %4558, %v993_v44   ;;  %v3239_v44 = vld [vmem:[%s6144_s5 + $0x38] sm:$0xff] }
 0x267   : > { %996 = vperm.xlu1 %4557, %v992_v43  }
 0x2c8   : > { %v724_v46 = vpop.permute.xlu0 %723 }
 0x2c9   : > { %v726_v45 = vpop.permute.xlu1 %725 }
 0x2ca   : > { %v728_v47 = vsel %vm408_vm4, %v724_v46, %v726_v45 }
 0x2cb   : > { %3865 = vmatprep.subr.mxu0 %v728_v47 }
 0x2cc   : > { %3866 = vmatpush3.msra.mxu0 %v728_v47  ;;  %v720_v49 = vpop.permute.xlu0 %719 }
 0x2cd   : > { %v722_v48 = vpop.permute.xlu1 %721 }
 0x2ce   : > { %v727_v50 = vsel %vm408_vm4, %v720_v49, %v722_v48  ;;  %v3243_v48 = vld [vmem:[%s6144_s5 + $0x48] sm:$0xff]  ;;  %v1549_v49 = vld [vmem:[%s6146_s7 + $0x78] sm:$0x3f] }
 0x2cf   : > { %3867 = vmatprep.subr.mxu0 %v727_v50 }
 0x2d0   : > { %3868 = vmatpush3.msra.mxu0 %v727_v50  ;;  %v902_v54 = vpop.permute.xlu0 %901  ;;  %v1548_v50 = vld [vmem:[%s6146_s7 + $0x70] sm:$0xff] }
 0x2d1   : > { %v904_v53 = vpop.permute.xlu1 %903  ;;  %3870 = vmatmul.mubr.msk.f32.vlgmr.msra.gmra.mxu0 %vm731_vm9, %v3219_v51  ;;  %3872 = vmatprep.subr.mxu0 %v709_v39  ;;  %v3263_v51 = vld [vmem:[%s6146_s7 + $0xf8] sm:$0x3f] }
 0x2d2   : > { %3873 = vmatpush3.msra.mxu0 %v709_v39  ;;  %3876 = vmatprep.mubr.msk.f32.mxu0 %vm731_vm9, %v706_v52  ;;  %v906_v57 = vsel %vm585_vm6, %v902_v54, %v904_v53  ;;  %v3262_v52 = vld [vmem:[%s6146_s7 + $0xf0] sm:$0xff]  ;;  %v1547_v53 = vld [vmem:[%s6146_s7 + $0x68] sm:$0xff] }
 0x2d3   : > { %3874 = vmatprep.subr.mxu0 %v708_v42  ;;  %v3261_v54 = vld [vmem:[%s6146_s7 + $0xe8] sm:$0xff] }
 0x2d4   : > { %3875 = vmatpush3.msra.mxu0 %v708_v42  ;;  %v898_v59 = vpop.permute.xlu0 %897 }
 0x2d5   : > { %v900_v58 = vpop.permute.xlu1 %899  ;;  %3877 = vmatmul.mubr.msk.f32.vlgmr.msra.gmra.mxu0 %vm731_vm9, %v707_v55  ;;  %3879 = vmatprep.subr.mxu0 %v906_v57  ;;  %v1546_v55 = vld [vmem:[%s6146_s7 + $0x60] sm:$0xff] }
 0x2d6   : > { %3880 = vmatpush3.msra.mxu0 %v906_v57  ;;  %v905_v60 = vsel %vm585_vm6, %v898_v59, %v900_v58  ;;  %3883 = vmatprep.mubr.msk.f32.mxu0 %vm731_vm9, %v3224_v56  ;;  %v3260_v56 = vld [vmem:[%s6146_s7 + $0xe0] sm:$0xff]  ;;  %v1545_v57 = vld [vmem:[%s6146_s7 + $0x58] sm:$0xff]  ;;  %v1544_v59 = vld [vmem:[%s6146_s7 + $0x50] sm:$0xff] }
 0x2d7   : > { %3881 = vmatprep.subr.mxu0 %v905_v60  ;;  %v3259_v58 = vld [vmem:[%s6146_s7 + $0xd8] sm:$0xff] }
 0x2d8   : > { %3882 = vmatpush3.msra.mxu0 %v905_v60  ;;  %v3258_v60 = vld [vmem:[%s6146_s7 + $0xd0] sm:$0xff] }
 0x2d9   : > { %3884 = vmatmul.mubr.msk.f32.vlgmr.msra.gmra.mxu0 %vm731_vm9, %v3225_v61  ;;  %v1543_v61 = vld [vmem:[%s6146_s7 + $0x48] sm:$0xff] }
 0x2da   : > { %3890 = vmatprep.mubr.msk.f32.mxu0 %vm731_vm9, %v3228_v18 }
 0x2e1   : > { %v1002_v7 = vpop.permute.xlu0 %1001 }
 0x2e2   : > { %v997_v11 = vpop.permute.xlu1 %996 }
 0x391   : > { %v3871_v62 = vpop.f32.mrf.mxu0 }
 0x393   : > { %v804_v63 = vpop.f32.mrf.mxu0 }
 0x395   : > { %v3878_v1 = vpop.f32.mrf.mxu0 }
 0x396   : > { %v891_v3 = vadd.f32 %v3878_v1, %v3871_v62  ;;  %v3257_v62 = vld [vmem:[%s6146_s7 + $0xc8] sm:$0xff]  ;;  %v3256_v1 = vld [vmem:[%s6146_s7 + $0xc0] sm:$0xff] }
 0x397   : > { %v885_v2 = vpop.f32.mrf.mxu0 }
 0x398   : > { %v886_v5 = vadd.f32 %v885_v2, %v804_v63  ;;  %v1542_v63 = vld [vmem:[%s6146_s7 + $0x40] sm:$0xff]  ;;  %v1541_v2 = vld [vmem:[%s6146_s7 + $0x38] sm:$0xff] }
 0x399   : > { %v3885_v4 = vpop.f32.mrf.mxu0 }
 0x39a   : > { %v991_v6 = vadd.f32 %v3885_v4, %v891_v3  ;;  %v3255_v3 = vld [vmem:[%s6146_s7 + $0xb8] sm:$0xff]  ;;  %v1540_v4 = vld [vmem:[%s6146_s7 + $0x30] sm:$0xff] }
 0x39b   : > { %v981_v8 = vpop.f32.mrf.mxu0 }
 0x39c   : > { %v1005_v9 = vadd.f32 %v1002_v7, %v991_v6  ;;  %v990_v10 = vadd.f32 %v981_v8, %v886_v5  ;;  %v3254_v5 = vld [vmem:[%s6146_s7 + $0xb0] sm:$0xff]  ;;  %v1539_v6 = vld [vmem:[%s6146_s7 + $0x28] sm:$0xff]  ;;  %v1538_v8 = vld [vmem:[%s6146_s7 + $0x20] sm:$0xff] }
 0x39d   : > { %v3253_v7 = vld [vmem:[%s6146_s7 + $0xa8] sm:$0xff] }
 0x39e   : > { %v1007_v12 = vmax.f32 %v1005_v9, 0.0  ;;  %v1004_v13 = vadd.f32 %v997_v11, %v990_v10  ;;  %v3252_v9 = vld [vmem:[%s6146_s7 + $0xa0] sm:$0xff]  ;;  %v1537_v10 = vld [vmem:[%s6146_s7 + $0x18] sm:$0xff] }
 0x39f   : > { %v3251_v11 = vld [vmem:[%s6146_s7 + $0x98] sm:$0xff] }
 0x3a0   : > { %v1006_v14 = vmax.f32 %v1004_v13, 0.0  ;;  %1016 = vrot.lane.b32.xlu0 %v1007_v12, %s4622_s15  ;;  %v1536_v12 = vld [vmem:[%s6146_s7 + $0x10] sm:$0xff] }
 0x3a1   : > { %v3250_v13 = vld [vmem:[%s6146_s7 + $0x90] sm:$0xff] }
 0x3a2   : > { %1014 = vrot.lane.b32.xlu1 %v1006_v14, %s4622_s15  ;;  %s4626_s15 = smov 125   ;;  %v1535_v14 = vld [vmem:[%s6146_s7 + $0x8] sm:$0xff] }
 0x412   : > { %v1017_v15 = vpop.permute.xlu0 %1016 }
 0x413   : > { %1022 = vst.msk [vmem:[#allocation2 + $0x10] sm:$0xff] %vm700_vm7, %v1017_v15 }
 0x414   : > { %1023 = vst.msk [vmem:[#allocation2 + $0x18] sm:$0xff] %vm702_vm8, %v1017_v15  ;;  %v1015_v16 = vpop.permute.xlu1 %1014 }
 0x415   : > { %1020 = vst.msk [vmem:[#allocation2] sm:$0xff] %vm700_vm7, %v1015_v16 }
 0x416   : > { %1021 = vst.msk [vmem:[#allocation2 + $0x8] sm:$0xff] %vm702_vm8, %v1015_v16 }
 0x41a   : > { %v1298_v19 = vld [vmem:[#allocation2 + $0x10] sm:$0xff] }
 0x41b   : > { %v1299_v20 = vld [vmem:[#allocation2 + $0x18] sm:$0xff]  ;;  %1308 = vrot.lane.b32.xlu1 %v1298_v19, %s4626_s15  ;;  %1517 = vst [vmem:[#allocation2 + $0x10] sm:$0xff] %v4621_v0  ;;  %1035 = vrot.lane.b32.xlu0 %v1298_v19, %s4624_s24 }
 0x41c   : > { %1518 = vst.msk [vmem:[#allocation2 + $0x18] sm:$0xff] %vm383_vm0, %v4621_v0  ;;  %3893 = vmatprep.subr.mxu1 %v1298_v19  ;;  %v1026_v21 = vld [vmem:[#allocation2] sm:$0xff] }
 0x41d   : > { %v1297_v22 = vld [vmem:[#allocation2 + $0x8] sm:$0xff]  ;;  %3894 = vmatpush3.msra.mxu1 %v1298_v19  ;;  %1515 = vst [vmem:[#allocation2] sm:$0xff] %v4621_v0 }
 0x41e   : > { %1516 = vst.msk [vmem:[#allocation2 + $0x8] sm:$0xff] %vm383_vm0, %v4621_v0  ;;  %3895 = vmatprep.subr.mxu1 %v1026_v21 }
 0x41f   : > { %3896 = vmatpush3.msra.mxu1 %v1026_v21  ;;  %1409 = vrot.lane.b32.xlu1 %v1299_v20, %s4627_s30 }
 0x420   : > { %1206 = vrot.lane.b32.xlu0 %v1298_v19, %s4625_s25  ;;  %3898 = vmatmul.mubr.msk.f32.vlgmr.msra.gmra.mxu1 %vm731_vm9, %v1025_v23 }
 0x421   : > { %3911 = vmatprep.mubr.msk.f32.mxu1 %vm731_vm9, %v3238_v24 }
 0x423   : > { %1033 = vrot.lane.b32.xlu1 %v1026_v21, %s4624_s24 }
 0x424   : > { %1310 = vrot.lane.b32.xlu0 %v1299_v20, %s4626_s15 }
 0x427   : > { %1204 = vrot.lane.b32.xlu1 %v1026_v21, %s4625_s25 }
 0x428   : > { %1407 = vrot.lane.b32.xlu0 %v1298_v19, %s4627_s30 }
 0x42b   : > { %1306 = vrot.lane.b32.xlu1 %v1297_v22, %s4626_s15 }
 0x42c   : > { %1304 = vrot.lane.b32.xlu0 %v1026_v21, %s4626_s15  ;;  %s4563_s15 = sshll.u32 %s4629_s21, 4  ;;  %s4564_s15 = int_to_ptr.vmem [resolvable:$false] %s4563_s15 }
 0x42f   : > { %1405 = vrot.lane.b32.xlu1 %v1297_v22, %s4627_s30 }
 0x430   : > { %1403 = vrot.lane.b32.xlu0 %v1026_v21, %s4627_s30  ;;  %s4565_s30 = scalar_lea.vmem %s4564_s15, 32 }
 0x434   : > { %1503 = vperm.xlu0 %4558, %v1499_v25  }
 0x438   : > { %1508 = vperm.xlu0 %4558, %v1500_v26  }
 0x48d   : > { %v1309_v27 = vpop.permute.xlu1 %1308  ;;  %v1036_v28 = vpop.permute.xlu0 %1035 }
 0x48e   : > { %3886 = vmatprep.subr.mxu0 %v1036_v28 }
 0x48f   : > { %3887 = vmatpush3.msra.mxu0 %v1036_v28 }
 0x491   : > { %v1410_v29 = vpop.permute.xlu1 %1409 }
 0x492   : > { %v1207_v30 = vpop.permute.xlu0 %1206 }
 0x495   : > { %v1034_v31 = vpop.permute.xlu1 %1033 }
 0x496   : > { %v1311_v32 = vpop.permute.xlu0 %1310  ;;  %3888 = vmatprep.subr.mxu0 %v1034_v31 }
 0x497   : > { %3889 = vmatpush3.msra.mxu0 %v1034_v31  ;;  %v1314_v34 = vsel %vm1312_vm10, %v1309_v27, %v1311_v32 }
 0x498   : > { %3907 = vmatprep.subr.mxu1 %v1314_v34  ;;  %3900 = vmatprep.subr.mxu0 %v1207_v30 }
 0x499   : > { %3908 = vmatpush3.msra.mxu1 %v1314_v34  ;;  %3891 = vmatmul.mubr.msk.f32.vlgmr.msra.gmra.mxu0 %vm731_vm9, %v3229_v33  ;;  %v1205_v36 = vpop.permute.xlu1 %1204 }
 0x49a   : > { %v1408_v37 = vpop.permute.xlu0 %1407  ;;  %3901 = vmatpush3.msra.mxu0 %v1207_v30  ;;  %3904 = vmatprep.mubr.msk.f32.mxu0 %vm731_vm9, %v3234_v35 }
 0x49b   : > { %3902 = vmatprep.subr.mxu0 %v1205_v36  ;;  %v1413_v39 = vsel %vm1411_vm11, %v1408_v37, %v1410_v29  ;;  %v3249_v37 = vld [vmem:[%s6146_s7 + $0x88] sm:$0xff] }
 0x49c   : > { %3903 = vmatpush3.msra.mxu0 %v1205_v36  ;;  %v1534_v36 = vld [vmem:[%s6146_s7] sm:$0xff] }
 0x49d   : > { %3914 = vmatprep.subr.mxu0 %v1413_v39  ;;  %3905 = vmatmul.mubr.msk.f32.vlgmr.msra.gmra.mxu0 %vm731_vm9, %v3235_v38  ;;  %v1307_v41 = vpop.permute.xlu1 %1306 }
 0x49e   : > { %v1305_v42 = vpop.permute.xlu0 %1304  ;;  %3915 = vmatpush3.msra.mxu0 %v1413_v39  ;;  %3918 = vmatprep.mubr.msk.f32.mxu0 %vm731_vm9, %v3242_v40  ;;  %v3248_v40 = vld [vmem:[%s6146_s7 + $0x80] sm:$0xff] }
 0x49f   : > { %v1313_v43 = vsel %vm1312_vm10, %v1305_v42, %v1307_v41 }
 0x4a0   : > { %3909 = vmatprep.subr.mxu1 %v1313_v43 }
 0x4a1   : > { %3910 = vmatpush3.msra.mxu1 %v1313_v43  ;;  %v1406_v45 = vpop.permute.xlu1 %1405 }
 0x4a2   : > { %v1404_v46 = vpop.permute.xlu0 %1403  ;;  %3912 = vmatmul.mubr.msk.f32.vlgmr.msra.gmra.mxu1 %vm731_vm9, %v3239_v44  ;;  %3921 = vmatprep.subr.mxu1 %v4621_v0 }
 0x4a3   : > { %v1412_v47 = vsel %vm1411_vm11, %v1404_v46, %v1406_v45  ;;  %3922 = vmatpush3.msk.msra.mxu1 %vm417_vm5, %v1549_v49  ;;  %3953 = vmatprep.mubr.msk.f32.mxu1 %vm4628_vm12, %v4621_v0  ;;  %v3281_v46 = vld [vmem:[%s6146_s7 + $0x178] sm:$0x3f] }
 0x4a4   : > { %3916 = vmatprep.subr.mxu0 %v1412_v47  ;;  %3923 = vmatprep.subr.mxu1 %v4621_v0  ;;  %v3299_v49 = vld [vmem:[%s6146_s7 + $0x1f8] sm:$0x3f] }
 0x4a5   : > { %3917 = vmatpush3.msra.mxu0 %v1412_v47  ;;  %3924 = vmatpush3.msra.mxu1 %v1548_v50  ;;  %v3279_v50 = vld [vmem:[%s6146_s7 + $0x168] sm:$0xff] }
 0x4a6   : > { %3919 = vmatmul.mubr.msk.f32.vlgmr.msra.gmra.mxu0 %vm731_vm9, %v3243_v48  ;;  %3956 = vmatprep.subr.mxu0 %v4621_v0  ;;  %v3280_v48 = vld [vmem:[%s6146_s7 + $0x170] sm:$0xff] }
 0x4a7   : > { %3957 = vmatpush3.msk.msra.mxu0 %vm417_vm5, %v3263_v51  ;;  %3925 = vmatprep.subr.mxu1 %v4621_v0  ;;  %v3298_v51 = vld [vmem:[%s6146_s7 + $0x1f0] sm:$0xff] }
 0x4a8   : > { %3958 = vmatprep.subr.mxu0 %v4621_v0  ;;  %3926 = vmatpush3.msra.mxu1 %v1547_v53  ;;  %v3297_v53 = vld [vmem:[%s6146_s7 + $0x1e8] sm:$0xff] }
 0x4a9   : > { %3959 = vmatpush3.msra.mxu0 %v3262_v52  ;;  %3927 = vmatprep.subr.mxu1 %v4621_v0  ;;  %v3278_v52 = vld [vmem:[%s6146_s7 + $0x160] sm:$0xff] }
 0x4aa   : > { %3960 = vmatprep.subr.mxu0 %v4621_v0  ;;  %3928 = vmatpush3.msra.mxu1 %v1546_v55  ;;  %v3296_v55 = vld [vmem:[%s6146_s7 + $0x1e0] sm:$0xff] }
 0x4ab   : > { %3961 = vmatpush3.msra.mxu0 %v3261_v54  ;;  %3929 = vmatprep.subr.mxu1 %v4621_v0  ;;  %v3277_v54 = vld [vmem:[%s6146_s7 + $0x158] sm:$0xff] }
 0x4ac   : > { %3962 = vmatprep.subr.mxu0 %v4621_v0  ;;  %3930 = vmatpush3.msra.mxu1 %v1545_v57  ;;  %v3295_v57 = vld [vmem:[%s6146_s7 + $0x1d8] sm:$0xff] }
 0x4ad   : > { %3963 = vmatpush3.msra.mxu0 %v3260_v56  ;;  %3931 = vmatprep.subr.mxu1 %v4621_v0  ;;  %v3276_v56 = vld [vmem:[%s6146_s7 + $0x150] sm:$0xff] }
 0x4ae   : > { %3964 = vmatprep.subr.mxu0 %v4621_v0  ;;  %3932 = vmatpush3.msra.mxu1 %v1544_v59  ;;  %v3294_v59 = vld [vmem:[%s6146_s7 + $0x1d0] sm:$0xff] }
 0x4af   : > { %3965 = vmatpush3.msra.mxu0 %v3259_v58  ;;  %3933 = vmatprep.subr.mxu1 %v4621_v0  ;;  %v1504_v21 = vpop.permute.xlu0 %1503  ;;  %v3275_v58 = vld [vmem:[%s6146_s7 + $0x148] sm:$0xff] }
 0x4b0   : > { %3966 = vmatprep.subr.mxu0 %v4621_v0  ;;  %3934 = vmatpush3.msra.mxu1 %v1543_v61  ;;  %v3293_v61 = vld [vmem:[%s6146_s7 + $0x1c8] sm:$0xff] }
 0x4b1   : > { %3967 = vmatpush3.msra.mxu0 %v3258_v60  ;;  %3935 = vmatprep.subr.mxu1 %v4621_v0  ;;  %v3274_v60 = vld [vmem:[%s6146_s7 + $0x140] sm:$0xff] }
 0x4b2   : > { %3968 = vmatprep.subr.mxu0 %v4621_v0  ;;  %3936 = vmatpush3.msra.mxu1 %v1542_v63  ;;  %v3292_v63 = vld [vmem:[%s6146_s7 + $0x1c0] sm:$0xff] }
 0x4b3   : > { %3969 = vmatpush3.msra.mxu0 %v3257_v62  ;;  %3937 = vmatprep.subr.mxu1 %v4621_v0  ;;  %v1509_v32 = vpop.permute.xlu0 %1508  ;;  %v3273_v62 = vld [vmem:[%s6146_s7 + $0x138] sm:$0xff] }
 0x4b4   : > { %3970 = vmatprep.subr.mxu0 %v4621_v0  ;;  %3938 = vmatpush3.msra.mxu1 %v1541_v2  ;;  %v3291_v2 = vld [vmem:[%s6146_s7 + $0x1b8] sm:$0xff] }
 0x4b5   : > { %3971 = vmatpush3.msra.mxu0 %v3256_v1  ;;  %3939 = vmatprep.subr.mxu1 %v4621_v0  ;;  %v3272_v1 = vld [vmem:[%s6146_s7 + $0x130] sm:$0xff] }
 0x4b6   : > { %3972 = vmatprep.subr.mxu0 %v4621_v0  ;;  %3940 = vmatpush3.msra.mxu1 %v1540_v4  ;;  %v3290_v4 = vld [vmem:[%s6146_s7 + $0x1b0] sm:$0xff] }
 0x4b7   : > { %3973 = vmatpush3.msra.mxu0 %v3255_v3  ;;  %3941 = vmatprep.subr.mxu1 %v4621_v0  ;;  %v3271_v3 = vld [vmem:[%s6146_s7 + $0x128] sm:$0xff] }
 0x4b8   : > { %3974 = vmatprep.subr.mxu0 %v4621_v0  ;;  %3942 = vmatpush3.msra.mxu1 %v1539_v6  ;;  %v3289_v6 = vld [vmem:[%s6146_s7 + $0x1a8] sm:$0xff] }
 0x4b9   : > { %3975 = vmatpush3.msra.mxu0 %v3254_v5  ;;  %3943 = vmatprep.subr.mxu1 %v4621_v0  ;;  %v3270_v5 = vld [vmem:[%s6146_s7 + $0x120] sm:$0xff] }
 0x4ba   : > { %3976 = vmatprep.subr.mxu0 %v4621_v0  ;;  %3944 = vmatpush3.msra.mxu1 %v1538_v8  ;;  %v3288_v8 = vld [vmem:[%s6146_s7 + $0x1a0] sm:$0xff] }
 0x4bb   : > { %3977 = vmatpush3.msra.mxu0 %v3253_v7  ;;  %3945 = vmatprep.subr.mxu1 %v4621_v0  ;;  %v3269_v7 = vld [vmem:[%s6146_s7 + $0x118] sm:$0xff] }
 0x4bc   : > { %3978 = vmatprep.subr.mxu0 %v4621_v0  ;;  %3946 = vmatpush3.msra.mxu1 %v1537_v10  ;;  %v3287_v10 = vld [vmem:[%s6146_s7 + $0x198] sm:$0xff] }
 0x4bd   : > { %3979 = vmatpush3.msra.mxu0 %v3252_v9  ;;  %3947 = vmatprep.subr.mxu1 %v4621_v0  ;;  %v3268_v9 = vld [vmem:[%s6146_s7 + $0x110] sm:$0xff] }
 0x4be   : > { %3980 = vmatprep.subr.mxu0 %v4621_v0  ;;  %3948 = vmatpush3.msra.mxu1 %v1536_v12  ;;  %v3286_v12 = vld [vmem:[%s6146_s7 + $0x190] sm:$0xff] }
 0x4bf   : > { %3981 = vmatpush3.msra.mxu0 %v3251_v11  ;;  %3949 = vmatprep.subr.mxu1 %v4621_v0  ;;  %v3267_v11 = vld [vmem:[%s6146_s7 + $0x108] sm:$0xff] }
 0x4c0   : > { %3982 = vmatprep.subr.mxu0 %v4621_v0  ;;  %3950 = vmatpush3.msra.mxu1 %v1535_v14  ;;  %v3285_v14 = vld [vmem:[%s6146_s7 + $0x188] sm:$0xff] }
 0x4c1   : > { %3983 = vmatpush3.msra.mxu0 %v3250_v13  ;;  %3951 = vmatprep.subr.mxu1 %v4621_v0  ;;  %v3266_v13 = vld [vmem:[%s6146_s7 + $0x100] sm:$0xff] }
 0x4c2   : > { %3984 = vmatprep.subr.mxu0 %v4621_v0  ;;  %3952 = vmatpush3.msra.mxu1 %v1534_v36  ;;  %v3308_v36 = vld [vmem:[%s6146_s7 + $0x230] sm:$0xff] }
 0x4c3   : > { %3985 = vmatpush3.msra.mxu0 %v3249_v37  ;;  %3991 = vmatprep.subr.mxu1 %v4621_v0  ;;  %v3327_v37 = vld [vmem:[%s6146_s7 + $0x2b8] sm:$0xff] }
 0x4c4   : > { %3986 = vmatprep.subr.mxu0 %v4621_v0  ;;  %3988 = vmatprep.mubr.msk.f32.mxu0 %vm4628_vm12, %v4621_v0 }
 0x4c5   : > { %3987 = vmatpush3.msra.mxu0 %v3248_v40  ;;  %v3326_v40 = vld [vmem:[%s6146_s7 + $0x2b0] sm:$0xff] }
 0x4c6   : > { %4026 = vmatprep.subr.mxu0 %v4621_v0 }
 0x4e0   : > { %v3899_v16 = vpop.f32.mrf.mxu1 }
 0x4e2   : > { %v1192_v19 = vpop.f32.mrf.mxu1 }
 0x559   : > { %v3892_v15 = vpop.f32.mrf.mxu0 }
 0x55a   : > { %v1198_v18 = vadd.f32 %v3899_v16, %v3892_v15  ;;  %v3284_v16 = vld [vmem:[%s6146_s7 + $0x180] sm:$0xff] }
 0x55b   : > { %v1111_v17 = vpop.f32.mrf.mxu0 }
 0x55c   : > { %v1193_v22 = vadd.f32 %v1192_v19, %v1111_v17  ;;  %v3317_v17 = vld [vmem:[%s6146_s7 + $0x278] sm:$0x3f]  ;;  %v3316_v19 = vld [vmem:[%s6146_s7 + $0x270] sm:$0xff] }
 0x55d   : > { %v3906_v20 = vpop.f32.mrf.mxu0 }
 0x55e   : > { %v1292_v23 = vadd.f32 %v3906_v20, %v1198_v18  ;;  %v3335_v20 = vld [vmem:[%s6146_s7 + $0x2f8] sm:$0x3f] }
 0x55f   : > { %v1282_v24 = vpop.f32.mrf.mxu0 }
 0x560   : > { %v1291_v27 = vadd.f32 %v1282_v24, %v1193_v22  ;;  %v3334_v22 = vld [vmem:[%s6146_s7 + $0x2f0] sm:$0xff]  ;;  %v3333_v24 = vld [vmem:[%s6146_s7 + $0x2e8] sm:$0xff] }
 0x562   : > { %v3913_v25 = vpop.f32.mrf.mxu1 }
 0x563   : > { %v1399_v28 = vadd.f32 %v3913_v25, %v1292_v23  ;;  %v3314_v23 = vld [vmem:[%s6146_s7 + $0x260] sm:$0xff]  ;;  %v3313_v25 = vld [vmem:[%s6146_s7 + $0x258] sm:$0xff] }
 0x564   : > { %v1389_v26 = vpop.f32.mrf.mxu1 }
 0x565   : > { %v1398_v30 = vadd.f32 %v1389_v26, %v1291_v27  ;;  %v3332_v26 = vld [vmem:[%s6146_s7 + $0x2e0] sm:$0xff]  ;;  %v3312_v27 = vld [vmem:[%s6146_s7 + $0x250] sm:$0xff] }
 0x566   : > { %v3920_v29 = vpop.f32.mrf.mxu0 }
 0x567   : > { %v1498_v31 = vadd.f32 %v3920_v29, %v1399_v28  ;;  %v3331_v28 = vld [vmem:[%s6146_s7 + $0x2d8] sm:$0xff]  ;;  %v3311_v29 = vld [vmem:[%s6146_s7 + $0x248] sm:$0xff] }
 0x568   : > { %v1488_v33 = vpop.f32.mrf.mxu0 }
 0x569   : > { %v5037_v34 = vadd.f32 %v1509_v32, %v1498_v31  ;;  %v1497_v35 = vadd.f32 %v1488_v33, %v1398_v30  ;;  %v3330_v30 = vld [vmem:[%s6146_s7 + $0x2d0] sm:$0xff]  ;;  %v3310_v31 = vld [vmem:[%s6146_s7 + $0x240] sm:$0xff]  ;;  %v3329_v32 = vld [vmem:[%s6146_s7 + $0x2c8] sm:$0xff] }
 0x56a   : > { %v3309_v33 = vld [vmem:[%s6146_s7 + $0x238] sm:$0xff] }
 0x56b   : > { %v1514_v38 = vmax.f32 %v5037_v34, 0.0  ;;  %v1511_v39 = vadd.f32 %v1504_v21, %v1497_v35  ;;  %v3315_v21 = vld [vmem:[%s6146_s7 + $0x268] sm:$0xff]  ;;  %v3328_v35 = vld [vmem:[%s6146_s7 + $0x2c0] sm:$0xff]  ;;  %v3425_v34 = vld [vmem:[%s6146_s7 + $0x578] sm:$0x3f] }
 0x56d   : > { %1520 = vst.msk [vmem:[#allocation2 + $0x10] sm:$0xff] %vm585_vm6, %v1514_v38  ;;  %v1513_v41 = vmax.f32 %v1511_v39, 0.0  ;;  %v3307_v39 = vld [vmem:[%s6146_s7 + $0x228] sm:$0xff] }
 0x56f   : > { %1519 = vst.msk [vmem:[#allocation2] sm:$0xff] %vm585_vm6, %v1513_v41 }
 0x574   : > { %v1522_v43 = vld [vmem:[#allocation2 + $0x10] sm:$0xff] }
 0x576   : > { %v1521_v42 = vld [vmem:[#allocation2] sm:$0xff] }
 0x577   : > { %1525 = vrot.lane.b32.xlu1 %v1521_v42, %s4624_s24  ;;  %v3325_v42 = vld [vmem:[%s6146_s7 + $0x2a8] sm:$0xff] }
 0x57b   : > { %1527 = vrot.lane.b32.xlu1 %v1522_v43, %s4624_s24  ;;  %v3305_v43 = vld [vmem:[%s6146_s7 + $0x218] sm:$0xff]  ;;  %s375_s24 = sand.u32 1, %s4611_s18  }
 0x57c   : > { %s376_s13 = scalar_lea.vmem [#allocation3], %s375_s24  ;;  %s3133_s25 = scalar_lea.sflag [#allocation4], %s375_s24 }
 0x57d   : > { %s3145_s14 = sshll.u32 %s376_s13, 4  ;;  %s3146_s14 = int_to_ptr.vmem [resolvable:$true] %s3145_s14 }
 0x57e   : > { %s4559_s0 = scalar_lea.vmem %s3146_s14, 16  ;;  %p4566_p0 = scmp.lt.s32.totalorder %s3146_s14, %s4564_s15 }
 0x57f   : > { %p4560_p11 = scmp.ne.s32.totalorder %s3146_s14, %s4559_s0  ;;  %p4567_p1 = scmp.lt.s32.totalorder %s4565_s30, %s4559_s0 }
 0x581   : > { %p4561_p12 = pnand %p4560_p11, %p4728_p5  ;;  %p4568_p2 = por %p4567_p1, %p4566_p0 }
 0x583   : > { %p4562_p13 = pneg %p4561_p12 }
 0x585   : > { %p4569_p3 = pnand %p4568_p2, %p4562_p13 }
 0x5e9   : > { %v1526_v44 = vpop.permute.xlu1 %1525 }
 0x5ea   : > { %v5062_v45 = vmax.f32 %v1513_v41, %v1526_v44  ;;  %v3306_v41 = vld [vmem:[%s6146_s7 + $0x220] sm:$0xff] }
 0x5eb   : > { %v3324_v44 = vld [vmem:[%s6146_s7 + $0x2a0] sm:$0xff] }
 0x5ec   : > { %3954 = vmatmul.mubr.msk.f32.vlgmr.msra.gmra.mxu1 %vm585_vm6, %v5062_v45  ;;  %v1644_v47 = vrot.slane %v5062_v45, 1  ;;  %v1738_v15 = vrot.slane %v5062_v45, 2  ;;  %v1832_v18 = vrot.slane %v5062_v45, 3 }
 0x5ed   : > { %3992 = vmatpush3.msk.msra.mxu1 %vm417_vm5, %v3281_v46  ;;  %4023 = vmatprep.mubr.msk.f32.mxu1 %vm4628_vm12, %v4621_v0  ;;  %v3304_v46 = vld [vmem:[%s6146_s7 + $0x210] sm:$0xff] }
 0x5ee   : > { %3993 = vmatprep.subr.mxu1 %v4621_v0  ;;  %3989 = vmatmul.mubr.msk.f32.vlgmr.msra.gmra.mxu0 %vm585_vm6, %v1644_v47  ;;  %v3323_v47 = vld [vmem:[%s6146_s7 + $0x298] sm:$0xff] }
 0x5ef   : > { %3994 = vmatpush3.msra.mxu1 %v3280_v48  ;;  %4027 = vmatpush3.msk.msra.mxu0 %vm417_vm5, %v3299_v49  ;;  %v3303_v48 = vld [vmem:[%s6146_s7 + $0x208] sm:$0xff]  ;;  %v3322_v49 = vld [vmem:[%s6146_s7 + $0x290] sm:$0xff] }
 0x5f0   : > { %3995 = vmatprep.subr.mxu1 %v4621_v0  ;;  %4028 = vmatprep.subr.mxu0 %v4621_v0 }
 0x5f1   : > { %3996 = vmatpush3.msra.mxu1 %v3279_v50  ;;  %4029 = vmatpush3.msra.mxu0 %v3298_v51  ;;  %v3302_v50 = vld [vmem:[%s6146_s7 + $0x200] sm:$0xff]  ;;  %v3321_v51 = vld [vmem:[%s6146_s7 + $0x288] sm:$0xff] }
 0x5f2   : > { %3997 = vmatprep.subr.mxu1 %v4621_v0  ;;  %4030 = vmatprep.subr.mxu0 %v4621_v0 }
 0x5f3   : > { %3998 = vmatpush3.msra.mxu1 %v3278_v52  ;;  %4031 = vmatpush3.msra.mxu0 %v3297_v53  ;;  %v1926_v52 = vrot.slane %v5062_v45, 4  ;;  %v3320_v53 = vld [vmem:[%s6146_s7 + $0x280] sm:$0xff] }
 0x5f4   : > { %3999 = vmatprep.subr.mxu1 %v4621_v0  ;;  %4032 = vmatprep.subr.mxu0 %v4621_v0 }
 0x5f5   : > { %4000 = vmatpush3.msra.mxu1 %v3277_v54  ;;  %4033 = vmatpush3.msra.mxu0 %v3296_v55  ;;  %v3353_v54 = vld [vmem:[%s6146_s7 + $0x378] sm:$0x3f]  ;;  %v2020_v55 = vrot.slane %v5062_v45, 5 }
 0x5f6   : > { %4001 = vmatprep.subr.mxu1 %v4621_v0  ;;  %4034 = vmatprep.subr.mxu0 %v4621_v0 }
 0x5f7   : > { %4002 = vmatpush3.msra.mxu1 %v3276_v56  ;;  %4035 = vmatpush3.msra.mxu0 %v3295_v57  ;;  %v3352_v56 = vld [vmem:[%s6146_s7 + $0x370] sm:$0xff]  ;;  %v3371_v57 = vld [vmem:[%s6146_s7 + $0x3f8] sm:$0x3f] }
 0x5f8   : > { %4003 = vmatprep.subr.mxu1 %v4621_v0  ;;  %4036 = vmatprep.subr.mxu0 %v4621_v0 }
 0x5f9   : > { %4004 = vmatpush3.msra.mxu1 %v3275_v58  ;;  %4037 = vmatpush3.msra.mxu0 %v3294_v59  ;;  %v3351_v58 = vld [vmem:[%s6146_s7 + $0x368] sm:$0xff]  ;;  %v3370_v59 = vld [vmem:[%s6146_s7 + $0x3f0] sm:$0xff] }
 0x5fa   : > { %4005 = vmatprep.subr.mxu1 %v4621_v0  ;;  %4038 = vmatprep.subr.mxu0 %v4621_v0 }
 0x5fb   : > { %4006 = vmatpush3.msra.mxu1 %v3274_v60  ;;  %4039 = vmatpush3.msra.mxu0 %v3293_v61  ;;  %v3350_v60 = vld [vmem:[%s6146_s7 + $0x360] sm:$0xff]  ;;  %v3369_v61 = vld [vmem:[%s6146_s7 + $0x3e8] sm:$0xff] }
 0x5fc   : > { %4007 = vmatprep.subr.mxu1 %v4621_v0  ;;  %4040 = vmatprep.subr.mxu0 %v4621_v0 }
 0x5fd   : > { %4008 = vmatpush3.msra.mxu1 %v3273_v62  ;;  %4041 = vmatpush3.msra.mxu0 %v3292_v63  ;;  %v3349_v62 = vld [vmem:[%s6146_s7 + $0x358] sm:$0xff]  ;;  %v3368_v63 = vld [vmem:[%s6146_s7 + $0x3e0] sm:$0xff] }
 0x5fe   : > { %4009 = vmatprep.subr.mxu1 %v4621_v0  ;;  %4042 = vmatprep.subr.mxu0 %v4621_v0 }
 0x5ff   : > { %4010 = vmatpush3.msra.mxu1 %v3272_v1  ;;  %4043 = vmatpush3.msra.mxu0 %v3291_v2  ;;  %v3348_v1 = vld [vmem:[%s6146_s7 + $0x350] sm:$0xff]  ;;  %v3367_v2 = vld [vmem:[%s6146_s7 + $0x3d8] sm:$0xff] }
 0x600   : > { %4011 = vmatprep.subr.mxu1 %v4621_v0  ;;  %4044 = vmatprep.subr.mxu0 %v4621_v0 }
 0x601   : > { %4012 = vmatpush3.msra.mxu1 %v3271_v3  ;;  %4045 = vmatpush3.msra.mxu0 %v3290_v4  ;;  %v3347_v3 = vld [vmem:[%s6146_s7 + $0x348] sm:$0xff]  ;;  %v3366_v4 = vld [vmem:[%s6146_s7 + $0x3d0] sm:$0xff] }
 0x602   : > { %4013 = vmatprep.subr.mxu1 %v4621_v0  ;;  %4046 = vmatprep.subr.mxu0 %v4621_v0 }
 0x603   : > { %4014 = vmatpush3.msra.mxu1 %v3270_v5  ;;  %4047 = vmatpush3.msra.mxu0 %v3289_v6  ;;  %v3346_v5 = vld [vmem:[%s6146_s7 + $0x340] sm:$0xff]  ;;  %v3365_v6 = vld [vmem:[%s6146_s7 + $0x3c8] sm:$0xff] }
 0x604   : > { %4015 = vmatprep.subr.mxu1 %v4621_v0  ;;  %4048 = vmatprep.subr.mxu0 %v4621_v0 }
 0x605   : > { %4016 = vmatpush3.msra.mxu1 %v3269_v7  ;;  %4049 = vmatpush3.msra.mxu0 %v3288_v8  ;;  %v3345_v7 = vld [vmem:[%s6146_s7 + $0x338] sm:$0xff]  ;;  %v3364_v8 = vld [vmem:[%s6146_s7 + $0x3c0] sm:$0xff] }
 0x606   : > { %4017 = vmatprep.subr.mxu1 %v4621_v0  ;;  %4050 = vmatprep.subr.mxu0 %v4621_v0 }
 0x607   : > { %4018 = vmatpush3.msra.mxu1 %v3268_v9  ;;  %4051 = vmatpush3.msra.mxu0 %v3287_v10  ;;  %v3344_v9 = vld [vmem:[%s6146_s7 + $0x330] sm:$0xff]  ;;  %v3363_v10 = vld [vmem:[%s6146_s7 + $0x3b8] sm:$0xff] }
 0x608   : > { %4019 = vmatprep.subr.mxu1 %v4621_v0  ;;  %4052 = vmatprep.subr.mxu0 %v4621_v0 }
 0x609   : > { %4020 = vmatpush3.msra.mxu1 %v3267_v11  ;;  %4053 = vmatpush3.msra.mxu0 %v3286_v12  ;;  %v3343_v11 = vld [vmem:[%s6146_s7 + $0x328] sm:$0xff]  ;;  %v3362_v12 = vld [vmem:[%s6146_s7 + $0x3b0] sm:$0xff] }
 0x60a   : > { %4021 = vmatprep.subr.mxu1 %v4621_v0  ;;  %4054 = vmatprep.subr.mxu0 %v4621_v0 }
 0x60b   : > { %4022 = vmatpush3.msra.mxu1 %v3266_v13  ;;  %4055 = vmatpush3.msra.mxu0 %v3285_v14  ;;  %v3342_v13 = vld [vmem:[%s6146_s7 + $0x320] sm:$0xff]  ;;  %v3361_v14 = vld [vmem:[%s6146_s7 + $0x3a8] sm:$0xff] }
 0x60c   : > { %4024 = vmatmul.mubr.msk.f32.vlgmr.msra.gmra.mxu1 %vm585_vm6, %v1738_v15  ;;  %4056 = vmatprep.subr.mxu0 %v4621_v0  ;;  %v3341_v15 = vld [vmem:[%s6146_s7 + $0x318] sm:$0xff] }
 0x60d   : > { %4061 = vmatprep.subr.mxu1 %v4621_v0  ;;  %4057 = vmatpush3.msra.mxu0 %v3284_v16  ;;  %v3360_v16 = vld [vmem:[%s6146_s7 + $0x3a0] sm:$0xff] }
 0x60e   : > { %4058 = vmatprep.mubr.msk.f32.mxu0 %vm4628_vm12, %v4621_v0  ;;  %4062 = vmatpush3.msk.msra.mxu1 %vm417_vm5, %v3317_v17  ;;  %v3340_v17 = vld [vmem:[%s6146_s7 + $0x310] sm:$0xff] }
 0x60f   : > { %4059 = vmatmul.mubr.msk.f32.vlgmr.msra.gmra.mxu0 %vm585_vm6, %v1832_v18  ;;  %4063 = vmatprep.subr.mxu1 %v4621_v0  ;;  %v3359_v18 = vld [vmem:[%s6146_s7 + $0x398] sm:$0xff] }
 0x610   : > { %4096 = vmatprep.subr.mxu0 %v4621_v0  ;;  %4064 = vmatpush3.msra.mxu1 %v3316_v19  ;;  %v3339_v19 = vld [vmem:[%s6146_s7 + $0x308] sm:$0xff] }
 0x611   : > { %4097 = vmatpush3.msk.msra.mxu0 %vm417_vm5, %v3335_v20  ;;  %4065 = vmatprep.subr.mxu1 %v4621_v0  ;;  %v3358_v20 = vld [vmem:[%s6146_s7 + $0x390] sm:$0xff] }
 0x612   : > { %4098 = vmatprep.subr.mxu0 %v4621_v0  ;;  %4066 = vmatpush3.msra.mxu1 %v3315_v21  ;;  %v3338_v21 = vld [vmem:[%s6146_s7 + $0x300] sm:$0xff] }
 0x613   : > { %4099 = vmatpush3.msra.mxu0 %v3334_v22  ;;  %4067 = vmatprep.subr.mxu1 %v4621_v0  ;;  %v3357_v22 = vld [vmem:[%s6146_s7 + $0x388] sm:$0xff] }
 0x614   : > { %4100 = vmatprep.subr.mxu0 %v4621_v0  ;;  %4068 = vmatpush3.msra.mxu1 %v3314_v23  ;;  %v2114_v23 = vrot.slane %v5062_v45, 6 }
 0x615   : > { %4101 = vmatpush3.msra.mxu0 %v3333_v24  ;;  %4069 = vmatprep.subr.mxu1 %v4621_v0  ;;  %v3356_v24 = vld [vmem:[%s6146_s7 + $0x380] sm:$0xff] }
 0x616   : > { %4102 = vmatprep.subr.mxu0 %v4621_v0  ;;  %4070 = vmatpush3.msra.mxu1 %v3313_v25  ;;  %v3389_v25 = vld [vmem:[%s6146_s7 + $0x478] sm:$0x3f] }
 0x617   : > { %4103 = vmatpush3.msra.mxu0 %v3332_v26  ;;  %4071 = vmatprep.subr.mxu1 %v4621_v0  ;;  %v2208_v26 = vrot.slane %v5062_v45, 7  ;;  %v3387_v45 = vld [vmem:[%s6146_s7 + $0x468] sm:$0xff] }
 0x618   : > { %4104 = vmatprep.subr.mxu0 %v4621_v0  ;;  %4072 = vmatpush3.msra.mxu1 %v3312_v27  ;;  %v3388_v27 = vld [vmem:[%s6146_s7 + $0x470] sm:$0xff] }
 0x619   : > { %4105 = vmatpush3.msra.mxu0 %v3331_v28  ;;  %4073 = vmatprep.subr.mxu1 %v4621_v0  ;;  %v3407_v28 = vld [vmem:[%s6146_s7 + $0x4f8] sm:$0x3f] }
 0x61a   : > { %4106 = vmatprep.subr.mxu0 %v4621_v0  ;;  %4074 = vmatpush3.msra.mxu1 %v3311_v29  ;;  %v3406_v29 = vld [vmem:[%s6146_s7 + $0x4f0] sm:$0xff] }
 0x61b   : > { %4107 = vmatpush3.msra.mxu0 %v3330_v30  ;;  %4075 = vmatprep.subr.mxu1 %v4621_v0  ;;  %v3386_v30 = vld [vmem:[%s6146_s7 + $0x460] sm:$0xff] }
 0x61c   : > { %4108 = vmatprep.subr.mxu0 %v4621_v0  ;;  %4076 = vmatpush3.msra.mxu1 %v3310_v31  ;;  %v3405_v31 = vld [vmem:[%s6146_s7 + $0x4e8] sm:$0xff] }
 0x61d   : > { %4109 = vmatpush3.msra.mxu0 %v3329_v32  ;;  %4077 = vmatprep.subr.mxu1 %v4621_v0  ;;  %v3385_v32 = vld [vmem:[%s6146_s7 + $0x458] sm:$0xff] }
 0x61e   : > { %4110 = vmatprep.subr.mxu0 %v4621_v0  ;;  %4078 = vmatpush3.msra.mxu1 %v3309_v33  ;;  %v3404_v33 = vld [vmem:[%s6146_s7 + $0x4e0] sm:$0xff] }
 0x61f   : > { %4111 = vmatpush3.msra.mxu0 %v3328_v35  ;;  %4079 = vmatprep.subr.mxu1 %v4621_v0  ;;  %v3384_v35 = vld [vmem:[%s6146_s7 + $0x450] sm:$0xff] }
 0x620   : > { %4112 = vmatprep.subr.mxu0 %v4621_v0  ;;  %4080 = vmatpush3.msra.mxu1 %v3308_v36  ;;  %v3403_v36 = vld [vmem:[%s6146_s7 + $0x4d8] sm:$0xff] }
 0x621   : > { %4113 = vmatpush3.msra.mxu0 %v3327_v37  ;;  %4081 = vmatprep.subr.mxu1 %v4621_v0  ;;  %v3383_v37 = vld [vmem:[%s6146_s7 + $0x448] sm:$0xff] }
 0x622   : > { %4114 = vmatprep.subr.mxu0 %v4621_v0  ;;  %4082 = vmatpush3.msra.mxu1 %v3307_v39  ;;  %v3402_v39 = vld [vmem:[%s6146_s7 + $0x4d0] sm:$0xff] }
 0x623   : > { %4115 = vmatpush3.msra.mxu0 %v3326_v40  ;;  %4083 = vmatprep.subr.mxu1 %v4621_v0  ;;  %v3382_v40 = vld [vmem:[%s6146_s7 + $0x440] sm:$0xff] }
 0x624   : > { %4116 = vmatprep.subr.mxu0 %v4621_v0  ;;  %4084 = vmatpush3.msra.mxu1 %v3306_v41  ;;  %v3401_v41 = vld [vmem:[%s6146_s7 + $0x4c8] sm:$0xff] }
 0x625   : > { %4117 = vmatpush3.msra.mxu0 %v3325_v42  ;;  %4085 = vmatprep.subr.mxu1 %v4621_v0  ;;  %v3381_v42 = vld [vmem:[%s6146_s7 + $0x438] sm:$0xff] }
 0x626   : > { %4118 = vmatprep.subr.mxu0 %v4621_v0  ;;  %4086 = vmatpush3.msra.mxu1 %v3305_v43  ;;  %v3400_v43 = vld [vmem:[%s6146_s7 + $0x4c0] sm:$0xff] }
 0x627   : > { %4119 = vmatpush3.msra.mxu0 %v3324_v44  ;;  %4087 = vmatprep.subr.mxu1 %v4621_v0  ;;  %v3380_v44 = vld [vmem:[%s6146_s7 + $0x430] sm:$0xff] }
 0x628   : > { %4120 = vmatprep.subr.mxu0 %v4621_v0  ;;  %4088 = vmatpush3.msra.mxu1 %v3304_v46  ;;  %v3399_v46 = vld [vmem:[%s6146_s7 + $0x4b8] sm:$0xff] }
 0x629   : > { %4121 = vmatpush3.msra.mxu0 %v3323_v47  ;;  %4089 = vmatprep.subr.mxu1 %v4621_v0  ;;  %v3379_v47 = vld [vmem:[%s6146_s7 + $0x428] sm:$0xff] }
 0x62a   : > { %4122 = vmatprep.subr.mxu0 %v4621_v0  ;;  %4090 = vmatpush3.msra.mxu1 %v3303_v48  ;;  %v3398_v48 = vld [vmem:[%s6146_s7 + $0x4b0] sm:$0xff] }
 0x62b   : > { %4123 = vmatpush3.msra.mxu0 %v3322_v49  ;;  %4091 = vmatprep.subr.mxu1 %v4621_v0  ;;  %v3378_v49 = vld [vmem:[%s6146_s7 + $0x420] sm:$0xff] }
 0x62c   : > { %4124 = vmatprep.subr.mxu0 %v4621_v0  ;;  %4092 = vmatpush3.msra.mxu1 %v3302_v50  ;;  %v3397_v50 = vld [vmem:[%s6146_s7 + $0x4a8] sm:$0xff] }
 0x62d   : > { %4093 = vmatprep.mubr.msk.f32.mxu1 %vm4628_vm12, %v4621_v0  ;;  %4125 = vmatpush3.msra.mxu0 %v3321_v51  ;;  %v3377_v51 = vld [vmem:[%s6146_s7 + $0x418] sm:$0xff] }
 0x62e   : > { %4094 = vmatmul.mubr.msk.f32.vlgmr.msra.gmra.mxu1 %vm585_vm6, %v1926_v52  ;;  %4126 = vmatprep.subr.mxu0 %v4621_v0  ;;  %v3396_v52 = vld [vmem:[%s6146_s7 + $0x4a0] sm:$0xff] }
 0x62f   : > { %4131 = vmatprep.subr.mxu1 %v4621_v0  ;;  %4127 = vmatpush3.msra.mxu0 %v3320_v53  ;;  %v3376_v53 = vld [vmem:[%s6146_s7 + $0x410] sm:$0xff] }
 0x630   : > { %4128 = vmatprep.mubr.msk.f32.mxu0 %vm4628_vm12, %v4621_v0  ;;  %4132 = vmatpush3.msk.msra.mxu1 %vm417_vm5, %v3353_v54  ;;  %v3395_v54 = vld [vmem:[%s6146_s7 + $0x498] sm:$0xff] }
 0x631   : > { %4129 = vmatmul.mubr.msk.f32.vlgmr.msra.gmra.mxu0 %vm585_vm6, %v2020_v55  ;;  %4133 = vmatprep.subr.mxu1 %v4621_v0  ;;  %v3375_v55 = vld [vmem:[%s6146_s7 + $0x408] sm:$0xff] }
 0x632   : > { %4166 = vmatprep.subr.mxu0 %v4621_v0  ;;  %4134 = vmatpush3.msra.mxu1 %v3352_v56  ;;  %v1528_v56 = vpop.permute.xlu1 %1527 }
 0x633   : > { %4167 = vmatpush3.msk.msra.mxu0 %vm417_vm5, %v3371_v57  ;;  %4135 = vmatprep.subr.mxu1 %v4621_v0  ;;  %v3394_v57 = vld [vmem:[%s6146_s7 + $0x490] sm:$0xff] }
 0x634   : > { %4168 = vmatprep.subr.mxu0 %v4621_v0  ;;  %4136 = vmatpush3.msra.mxu1 %v3351_v58  ;;  %v3374_v58 = vld [vmem:[%s6146_s7 + $0x400] sm:$0xff] }
 0x635   : > { %4169 = vmatpush3.msra.mxu0 %v3370_v59  ;;  %4137 = vmatprep.subr.mxu1 %v4621_v0  ;;  %v3393_v59 = vld [vmem:[%s6146_s7 + $0x488] sm:$0xff] }
 0x636   : > { %4170 = vmatprep.subr.mxu0 %v4621_v0  ;;  %4138 = vmatpush3.msra.mxu1 %v3350_v60  ;;  %v5606_v60 = vmax.f32 %v1514_v38, %v1528_v56  ;;  %v3469_v56 = vld [vmem:[%s6146_s7 + $0x6a8] sm:$0xff] }
 0x637   : > { %4171 = vmatpush3.msra.mxu0 %v3369_v61  ;;  %4139 = vmatprep.subr.mxu1 %v4621_v0  ;;  %v3392_v61 = vld [vmem:[%s6146_s7 + $0x480] sm:$0xff] }
 0x638   : > { %4172 = vmatprep.subr.mxu0 %v4621_v0  ;;  %4140 = vmatpush3.msra.mxu1 %v3349_v62  ;;  %v2396_v38 = vrot.slane %v5606_v60, 1  ;;  %v3424_v62 = vld [vmem:[%s6146_s7 + $0x570] sm:$0xff] }
 0x639   : > { %4173 = vmatpush3.msra.mxu0 %v3368_v63  ;;  %4141 = vmatprep.subr.mxu1 %v4621_v0  ;;  %v3443_v63 = vld [vmem:[%s6146_s7 + $0x5f8] sm:$0x3f] }
 0x63a   : > { %4174 = vmatprep.subr.mxu0 %v4621_v0  ;;  %4142 = vmatpush3.msra.mxu1 %v3348_v1  ;;  %v3423_v1 = vld [vmem:[%s6146_s7 + $0x568] sm:$0xff] }
 0x63b   : > { %4175 = vmatpush3.msra.mxu0 %v3367_v2  ;;  %4143 = vmatprep.subr.mxu1 %v4621_v0  ;;  %v3442_v2 = vld [vmem:[%s6146_s7 + $0x5f0] sm:$0xff] }
 0x63c   : > { %4176 = vmatprep.subr.mxu0 %v4621_v0  ;;  %4144 = vmatpush3.msra.mxu1 %v3347_v3  ;;  %v3422_v3 = vld [vmem:[%s6146_s7 + $0x560] sm:$0xff] }
 0x63d   : > { %4177 = vmatpush3.msra.mxu0 %v3366_v4  ;;  %4145 = vmatprep.subr.mxu1 %v4621_v0  ;;  %v3441_v4 = vld [vmem:[%s6146_s7 + $0x5e8] sm:$0xff] }
 0x63e   : > { %4178 = vmatprep.subr.mxu0 %v4621_v0  ;;  %4146 = vmatpush3.msra.mxu1 %v3346_v5  ;;  %v3421_v5 = vld [vmem:[%s6146_s7 + $0x558] sm:$0xff] }
 0x63f   : > { %4179 = vmatpush3.msra.mxu0 %v3365_v6  ;;  %4147 = vmatprep.subr.mxu1 %v4621_v0  ;;  %v3440_v6 = vld [vmem:[%s6146_s7 + $0x5e0] sm:$0xff] }
 0x640   : > { %4180 = vmatprep.subr.mxu0 %v4621_v0  ;;  %4148 = vmatpush3.msra.mxu1 %v3345_v7  ;;  %v3420_v7 = vld [vmem:[%s6146_s7 + $0x550] sm:$0xff] }
 0x641   : > { %4181 = vmatpush3.msra.mxu0 %v3364_v8  ;;  %4149 = vmatprep.subr.mxu1 %v4621_v0  ;;  %v3439_v8 = vld [vmem:[%s6146_s7 + $0x5d8] sm:$0xff] }
 0x642   : > { %4182 = vmatprep.subr.mxu0 %v4621_v0  ;;  %4150 = vmatpush3.msra.mxu1 %v3344_v9  ;;  %v3419_v9 = vld [vmem:[%s6146_s7 + $0x548] sm:$0xff] }
 0x643   : > { %4183 = vmatpush3.msra.mxu0 %v3363_v10  ;;  %4151 = vmatprep.subr.mxu1 %v4621_v0  ;;  %v3438_v10 = vld [vmem:[%s6146_s7 + $0x5d0] sm:$0xff] }
 0x644   : > { %4184 = vmatprep.subr.mxu0 %v4621_v0  ;;  %4152 = vmatpush3.msra.mxu1 %v3343_v11  ;;  %v3418_v11 = vld [vmem:[%s6146_s7 + $0x540] sm:$0xff] }
 0x645   : > { %4185 = vmatpush3.msra.mxu0 %v3362_v12  ;;  %4153 = vmatprep.subr.mxu1 %v4621_v0  ;;  %v3437_v12 = vld [vmem:[%s6146_s7 + $0x5c8] sm:$0xff] }
 0x646   : > { %4186 = vmatprep.subr.mxu0 %v4621_v0  ;;  %4154 = vmatpush3.msra.mxu1 %v3342_v13  ;;  %v3417_v13 = vld [vmem:[%s6146_s7 + $0x538] sm:$0xff] }
 0x647   : > { %4187 = vmatpush3.msra.mxu0 %v3361_v14  ;;  %4155 = vmatprep.subr.mxu1 %v4621_v0  ;;  %v3436_v14 = vld [vmem:[%s6146_s7 + $0x5c0] sm:$0xff] }
 0x648   : > { %4188 = vmatprep.subr.mxu0 %v4621_v0  ;;  %4156 = vmatpush3.msra.mxu1 %v3341_v15  ;;  %v3416_v15 = vld [vmem:[%s6146_s7 + $0x530] sm:$0xff] }
 0x649   : > { %4189 = vmatpush3.msra.mxu0 %v3360_v16  ;;  %4157 = vmatprep.subr.mxu1 %v4621_v0  ;;  %v3435_v16 = vld [vmem:[%s6146_s7 + $0x5b8] sm:$0xff] }
 0x64a   : > { %4190 = vmatprep.subr.mxu0 %v4621_v0  ;;  %4158 = vmatpush3.msra.mxu1 %v3340_v17  ;;  %v3415_v17 = vld [vmem:[%s6146_s7 + $0x528] sm:$0xff] }
 0x64b   : > { %4191 = vmatpush3.msra.mxu0 %v3359_v18  ;;  %4159 = vmatprep.subr.mxu1 %v4621_v0  ;;  %v3434_v18 = vld [vmem:[%s6146_s7 + $0x5b0] sm:$0xff] }
 0x64c   : > { %4192 = vmatprep.subr.mxu0 %v4621_v0  ;;  %4160 = vmatpush3.msra.mxu1 %v3339_v19  ;;  %v3414_v19 = vld [vmem:[%s6146_s7 + $0x520] sm:$0xff] }
 0x64d   : > { %4193 = vmatpush3.msra.mxu0 %v3358_v20  ;;  %4161 = vmatprep.subr.mxu1 %v4621_v0  ;;  %v3433_v20 = vld [vmem:[%s6146_s7 + $0x5a8] sm:$0xff] }
 0x64e   : > { %4194 = vmatprep.subr.mxu0 %v4621_v0  ;;  %4162 = vmatpush3.msra.mxu1 %v3338_v21  ;;  %v3413_v21 = vld [vmem:[%s6146_s7 + $0x518] sm:$0xff] }
 0x64f   : > { %4163 = vmatprep.mubr.msk.f32.mxu1 %vm4628_vm12, %v4621_v0  ;;  %4195 = vmatpush3.msra.mxu0 %v3357_v22  ;;  %v3432_v22 = vld [vmem:[%s6146_s7 + $0x5a0] sm:$0xff] }
 0x650   : > { %4164 = vmatmul.mubr.msk.f32.vlgmr.msra.gmra.mxu1 %vm585_vm6, %v2114_v23  ;;  %4196 = vmatprep.subr.mxu0 %v4621_v0  ;;  %v3412_v23 = vld [vmem:[%s6146_s7 + $0x510] sm:$0xff] }
 0x651   : > { %4201 = vmatprep.subr.mxu1 %v4621_v0  ;;  %4197 = vmatpush3.msra.mxu0 %v3356_v24  ;;  %v3431_v24 = vld [vmem:[%s6146_s7 + $0x598] sm:$0xff] }
 0x652   : > { %4198 = vmatprep.mubr.msk.f32.mxu0 %vm4628_vm12, %v4621_v0  ;;  %4202 = vmatpush3.msk.msra.mxu1 %vm417_vm5, %v3389_v25  ;;  %v3411_v25 = vld [vmem:[%s6146_s7 + $0x508] sm:$0xff] }
 0x653   : > { %4199 = vmatmul.mubr.msk.f32.vlgmr.msra.gmra.mxu0 %vm585_vm6, %v2208_v26  ;;  %4203 = vmatprep.subr.mxu1 %v4621_v0  ;;  %v3430_v26 = vld [vmem:[%s6146_s7 + $0x590] sm:$0xff] }
 0x654   : > { %4236 = vmatprep.subr.mxu0 %v4621_v0  ;;  %4204 = vmatpush3.msra.mxu1 %v3388_v27  ;;  %v3410_v27 = vld [vmem:[%s6146_s7 + $0x500] sm:$0xff] }
 0x655   : > { %4237 = vmatpush3.msk.msra.mxu0 %vm417_vm5, %v3407_v28  ;;  %4205 = vmatprep.subr.mxu1 %v4621_v0  ;;  %v3429_v28 = vld [vmem:[%s6146_s7 + $0x588] sm:$0xff] }
 0x656   : > { %4238 = vmatprep.subr.mxu0 %v4621_v0  ;;  %4206 = vmatpush3.msra.mxu1 %v3387_v45  ;;  %v2490_v45 = vrot.slane %v5606_v60, 2 }
 0x657   : > { %4239 = vmatpush3.msra.mxu0 %v3406_v29  ;;  %4207 = vmatprep.subr.mxu1 %v4621_v0  ;;  %v3428_v29 = vld [vmem:[%s6146_s7 + $0x580] sm:$0xff] }
 0x658   : > { %4240 = vmatprep.subr.mxu0 %v4621_v0  ;;  %4208 = vmatpush3.msra.mxu1 %v3386_v30  ;;  %v3461_v30 = vld [vmem:[%s6146_s7 + $0x678] sm:$0x3f] }
 0x659   : > { %4241 = vmatpush3.msra.mxu0 %v3405_v31  ;;  %4209 = vmatprep.subr.mxu1 %v4621_v0  ;;  %v2584_v31 = vrot.slane %v5606_v60, 3 }
 0x65a   : > { %4242 = vmatprep.subr.mxu0 %v4621_v0  ;;  %4210 = vmatpush3.msra.mxu1 %v3385_v32  ;;  %v3460_v32 = vld [vmem:[%s6146_s7 + $0x670] sm:$0xff] }
 0x65b   : > { %4243 = vmatpush3.msra.mxu0 %v3404_v33  ;;  %4211 = vmatprep.subr.mxu1 %v4621_v0  ;;  %v3479_v33 = vld [vmem:[%s6146_s7 + $0x6f8] sm:$0x3f] }
 0x65c   : > { %4244 = vmatprep.subr.mxu0 %v4621_v0  ;;  %4212 = vmatpush3.msra.mxu1 %v3384_v35  ;;  %v3459_v35 = vld [vmem:[%s6146_s7 + $0x668] sm:$0xff] }
 0x65d   : > { %4245 = vmatpush3.msra.mxu0 %v3403_v36  ;;  %4213 = vmatprep.subr.mxu1 %v4621_v0  ;;  %v3478_v36 = vld [vmem:[%s6146_s7 + $0x6f0] sm:$0xff] }
 0x65e   : > { %4246 = vmatprep.subr.mxu0 %v4621_v0  ;;  %4214 = vmatpush3.msra.mxu1 %v3383_v37  ;;  %v3458_v37 = vld [vmem:[%s6146_s7 + $0x660] sm:$0xff] }
 0x65f   : > { %4247 = vmatpush3.msra.mxu0 %v3402_v39  ;;  %4215 = vmatprep.subr.mxu1 %v4621_v0  ;;  %v3477_v39 = vld [vmem:[%s6146_s7 + $0x6e8] sm:$0xff] }
 0x660   : > { %4248 = vmatprep.subr.mxu0 %v4621_v0  ;;  %4216 = vmatpush3.msra.mxu1 %v3382_v40  ;;  %v3457_v40 = vld [vmem:[%s6146_s7 + $0x658] sm:$0xff] }
 0x661   : > { %4249 = vmatpush3.msra.mxu0 %v3401_v41  ;;  %4217 = vmatprep.subr.mxu1 %v4621_v0  ;;  %v3476_v41 = vld [vmem:[%s6146_s7 + $0x6e0] sm:$0xff] }
 0x662   : > { %4250 = vmatprep.subr.mxu0 %v4621_v0  ;;  %4218 = vmatpush3.msra.mxu1 %v3381_v42  ;;  %v3456_v42 = vld [vmem:[%s6146_s7 + $0x650] sm:$0xff] }
 0x663   : > { %4251 = vmatpush3.msra.mxu0 %v3400_v43  ;;  %4219 = vmatprep.subr.mxu1 %v4621_v0  ;;  %v3475_v43 = vld [vmem:[%s6146_s7 + $0x6d8] sm:$0xff] }
 0x664   : > { %4252 = vmatprep.subr.mxu0 %v4621_v0  ;;  %4220 = vmatpush3.msra.mxu1 %v3380_v44  ;;  %v3455_v44 = vld [vmem:[%s6146_s7 + $0x648] sm:$0xff] }
 0x665   : > { %4253 = vmatpush3.msra.mxu0 %v3399_v46  ;;  %4221 = vmatprep.subr.mxu1 %v4621_v0  ;;  %v3474_v46 = vld [vmem:[%s6146_s7 + $0x6d0] sm:$0xff] }
 0x666   : > { %4254 = vmatprep.subr.mxu0 %v4621_v0  ;;  %4222 = vmatpush3.msra.mxu1 %v3379_v47  ;;  %v3454_v47 = vld [vmem:[%s6146_s7 + $0x640] sm:$0xff] }
 0x667   : > { %4255 = vmatpush3.msra.mxu0 %v3398_v48  ;;  %4223 = vmatprep.subr.mxu1 %v4621_v0  ;;  %v3473_v48 = vld [vmem:[%s6146_s7 + $0x6c8] sm:$0xff] }
 0x668   : > { %4256 = vmatprep.subr.mxu0 %v4621_v0  ;;  %4224 = vmatpush3.msra.mxu1 %v3378_v49  ;;  %v3453_v49 = vld [vmem:[%s6146_s7 + $0x638] sm:$0xff] }
 0x669   : > { %4257 = vmatpush3.msra.mxu0 %v3397_v50  ;;  %4225 = vmatprep.subr.mxu1 %v4621_v0  ;;  %v3472_v50 = vld [vmem:[%s6146_s7 + $0x6c0] sm:$0xff] }
 0x66a   : > { %4258 = vmatprep.subr.mxu0 %v4621_v0  ;;  %4226 = vmatpush3.msra.mxu1 %v3377_v51  ;;  %v3452_v51 = vld [vmem:[%s6146_s7 + $0x630] sm:$0xff] }
 0x66b   : > { %4259 = vmatpush3.msra.mxu0 %v3396_v52  ;;  %4227 = vmatprep.subr.mxu1 %v4621_v0  ;;  %v3471_v52 = vld [vmem:[%s6146_s7 + $0x6b8] sm:$0xff] }
 0x66c   : > { %4260 = vmatprep.subr.mxu0 %v4621_v0  ;;  %4228 = vmatpush3.msra.mxu1 %v3376_v53  ;;  %v3451_v53 = vld [vmem:[%s6146_s7 + $0x628] sm:$0xff] }
 0x66d   : > { %4261 = vmatpush3.msra.mxu0 %v3395_v54  ;;  %4229 = vmatprep.subr.mxu1 %v4621_v0  ;;  %v3470_v54 = vld [vmem:[%s6146_s7 + $0x6b0] sm:$0xff] }
 0x66e   : > { %4262 = vmatprep.subr.mxu0 %v4621_v0  ;;  %4230 = vmatpush3.msra.mxu1 %v3375_v55  ;;  %v3450_v55 = vld [vmem:[%s6146_s7 + $0x620] sm:$0xff] }
 0x66f   : > { %4263 = vmatpush3.msra.mxu0 %v3394_v57  ;;  %4231 = vmatprep.subr.mxu1 %v4621_v0  ;;  %v1533_v57 = vld [vmem:[%s6147_s8] sm:$0x1] }
 0x670   : > { %4264 = vmatprep.subr.mxu0 %v4621_v0  ;;  %4232 = vmatpush3.msra.mxu1 %v3374_v58  ;;  %v3449_v58 = vld [vmem:[%s6146_s7 + $0x618] sm:$0xff] }
 0x671   : > { %4233 = vmatprep.mubr.msk.f32.mxu1 %vm4628_vm12, %v4621_v0  ;;  %4265 = vmatpush3.msra.mxu0 %v3393_v59  ;;  %v3468_v59 = vld [vmem:[%s6146_s7 + $0x6a0] sm:$0xff] }
 0x672   : > { %4234 = vmatmul.mubr.msk.f32.vlgmr.msra.gmra.mxu1 %vm585_vm6, %v5606_v60  ;;  %4266 = vmatprep.subr.mxu0 %v4621_v0 }
 0x673   : > { %4271 = vmatprep.subr.mxu1 %v4621_v0  ;;  %4267 = vmatpush3.msra.mxu0 %v3392_v61 }
 0x674   : > { %4268 = vmatprep.mubr.msk.f32.mxu0 %vm4628_vm12, %v4621_v0  ;;  %4272 = vmatpush3.msk.msra.mxu1 %vm417_vm5, %v3425_v34  ;;  %v3448_v34 = vld [vmem:[%s6146_s7 + $0x610] sm:$0xff] }
 0x675   : > { %4269 = vmatmul.mubr.msk.f32.vlgmr.msra.gmra.mxu0 %vm585_vm6, %v2396_v38  ;;  %4273 = vmatprep.subr.mxu1 %v4621_v0 }
 0x676   : > { %4306 = vmatprep.subr.mxu0 %v4621_v0  ;;  %4274 = vmatpush3.msra.mxu1 %v3424_v62  ;;  %v3467_v62 = vld [vmem:[%s6146_s7 + $0x698] sm:$0xff] }
 0x677   : > { %4307 = vmatpush3.msk.msra.mxu0 %vm417_vm5, %v3443_v63  ;;  %4275 = vmatprep.subr.mxu1 %v4621_v0 }
 0x678   : > { %4308 = vmatprep.subr.mxu0 %v4621_v0  ;;  %4276 = vmatpush3.msra.mxu1 %v3423_v1 }
 0x679   : > { %4309 = vmatpush3.msra.mxu0 %v3442_v2  ;;  %4277 = vmatprep.subr.mxu1 %v4621_v0  ;;  %v3447_v2 = vld [vmem:[%s6146_s7 + $0x608] sm:$0xff] }
 0x67a   : > { %4310 = vmatprep.subr.mxu0 %v4621_v0  ;;  %4278 = vmatpush3.msra.mxu1 %v3422_v3 }
 0x67b   : > { %4311 = vmatpush3.msra.mxu0 %v3441_v4  ;;  %4279 = vmatprep.subr.mxu1 %v4621_v0  ;;  %v3466_v4 = vld [vmem:[%s6146_s7 + $0x690] sm:$0xff] }
 0x67c   : > { %4312 = vmatprep.subr.mxu0 %v4621_v0  ;;  %4280 = vmatpush3.msra.mxu1 %v3421_v5 }
 0x67d   : > { %4313 = vmatpush3.msra.mxu0 %v3440_v6  ;;  %4281 = vmatprep.subr.mxu1 %v4621_v0  ;;  %v3446_v6 = vld [vmem:[%s6146_s7 + $0x600] sm:$0xff] }
 0x67e   : > { %4314 = vmatprep.subr.mxu0 %v4621_v0  ;;  %4282 = vmatpush3.msra.mxu1 %v3420_v7  ;;  %v3465_v7 = vld [vmem:[%s6146_s7 + $0x688] sm:$0xff] }
 0x67f   : > { %4315 = vmatpush3.msra.mxu0 %v3439_v8  ;;  %4283 = vmatprep.subr.mxu1 %v4621_v0  ;;  %v2678_v8 = vrot.slane %v5606_v60, 4 }
 0x680   : > { %4316 = vmatprep.subr.mxu0 %v4621_v0  ;;  %4284 = vmatpush3.msra.mxu1 %v3419_v9  ;;  %v3464_v9 = vld [vmem:[%s6146_s7 + $0x680] sm:$0xff] }
 0x681   : > { %4317 = vmatpush3.msra.mxu0 %v3438_v10  ;;  %4285 = vmatprep.subr.mxu1 %v4621_v0  ;;  %v3497_v10 = vld [vmem:[%s6146_s7 + $0x778] sm:$0x3f] }
 0x682   : > { %4318 = vmatprep.subr.mxu0 %v4621_v0  ;;  %4286 = vmatpush3.msra.mxu1 %v3418_v11  ;;  %v2772_v11 = vrot.slane %v5606_v60, 5 }
 0x683   : > { %4319 = vmatpush3.msra.mxu0 %v3437_v12  ;;  %4287 = vmatprep.subr.mxu1 %v4621_v0  ;;  %v3496_v12 = vld [vmem:[%s6146_s7 + $0x770] sm:$0xff] }
 0x684   : > { %4320 = vmatprep.subr.mxu0 %v4621_v0  ;;  %4288 = vmatpush3.msra.mxu1 %v3417_v13  ;;  %v3515_v13 = vld [vmem:[%s6146_s7 + $0x7f8] sm:$0x3f] }
 0x685   : > { %4321 = vmatpush3.msra.mxu0 %v3436_v14  ;;  %4289 = vmatprep.subr.mxu1 %v4621_v0  ;;  %v3495_v14 = vld [vmem:[%s6146_s7 + $0x768] sm:$0xff] }
 0x686   : > { %4322 = vmatprep.subr.mxu0 %v4621_v0  ;;  %4290 = vmatpush3.msra.mxu1 %v3416_v15  ;;  %v3514_v15 = vld [vmem:[%s6146_s7 + $0x7f0] sm:$0xff] }
 0x687   : > { %4323 = vmatpush3.msra.mxu0 %v3435_v16  ;;  %4291 = vmatprep.subr.mxu1 %v4621_v0  ;;  %v3494_v16 = vld [vmem:[%s6146_s7 + $0x760] sm:$0xff] }
 0x688   : > { %4324 = vmatprep.subr.mxu0 %v4621_v0  ;;  %4292 = vmatpush3.msra.mxu1 %v3415_v17  ;;  %v3513_v17 = vld [vmem:[%s6146_s7 + $0x7e8] sm:$0xff] }
 0x689   : > { %4325 = vmatpush3.msra.mxu0 %v3434_v18  ;;  %4293 = vmatprep.subr.mxu1 %v4621_v0  ;;  %v3493_v18 = vld [vmem:[%s6146_s7 + $0x758] sm:$0xff] }
 0x68a   : > { %4326 = vmatprep.subr.mxu0 %v4621_v0  ;;  %4294 = vmatpush3.msra.mxu1 %v3414_v19  ;;  %v3512_v19 = vld [vmem:[%s6146_s7 + $0x7e0] sm:$0xff] }
 0x68b   : > { %4327 = vmatpush3.msra.mxu0 %v3433_v20  ;;  %4295 = vmatprep.subr.mxu1 %v4621_v0  ;;  %v3492_v20 = vld [vmem:[%s6146_s7 + $0x750] sm:$0xff] }
 0x68c   : > { %4328 = vmatprep.subr.mxu0 %v4621_v0  ;;  %4296 = vmatpush3.msra.mxu1 %v3413_v21  ;;  %v3511_v21 = vld [vmem:[%s6146_s7 + $0x7d8] sm:$0xff] }
 0x68d   : > { %4329 = vmatpush3.msra.mxu0 %v3432_v22  ;;  %4297 = vmatprep.subr.mxu1 %v4621_v0  ;;  %v3491_v22 = vld [vmem:[%s6146_s7 + $0x748] sm:$0xff] }
 0x68e   : > { %4330 = vmatprep.subr.mxu0 %v4621_v0  ;;  %4298 = vmatpush3.msra.mxu1 %v3412_v23  ;;  %v3510_v23 = vld [vmem:[%s6146_s7 + $0x7d0] sm:$0xff] }
 0x68f   : > { %4331 = vmatpush3.msra.mxu0 %v3431_v24  ;;  %4299 = vmatprep.subr.mxu1 %v4621_v0  ;;  %v3490_v24 = vld [vmem:[%s6146_s7 + $0x740] sm:$0xff] }
 0x690   : > { %4332 = vmatprep.subr.mxu0 %v4621_v0  ;;  %4300 = vmatpush3.msra.mxu1 %v3411_v25  ;;  %v3509_v25 = vld [vmem:[%s6146_s7 + $0x7c8] sm:$0xff] }
 0x691   : > { %4333 = vmatpush3.msra.mxu0 %v3430_v26  ;;  %4301 = vmatprep.subr.mxu1 %v4621_v0  ;;  %v3489_v26 = vld [vmem:[%s6146_s7 + $0x738] sm:$0xff] }
 0x692   : > { %4334 = vmatprep.subr.mxu0 %v4621_v0  ;;  %4302 = vmatpush3.msra.mxu1 %v3410_v27  ;;  %v3508_v27 = vld [vmem:[%s6146_s7 + $0x7c0] sm:$0xff] }
 0x693   : > { %4303 = vmatprep.mubr.msk.f32.mxu1 %vm4628_vm12, %v4621_v0  ;;  %4335 = vmatpush3.msra.mxu0 %v3429_v28  ;;  %v3488_v28 = vld [vmem:[%s6146_s7 + $0x730] sm:$0xff] }
 0x694   : > { %4304 = vmatmul.mubr.msk.f32.vlgmr.msra.gmra.mxu1 %vm585_vm6, %v2490_v45  ;;  %4336 = vmatprep.subr.mxu0 %v4621_v0  ;;  %v3507_v45 = vld [vmem:[%s6146_s7 + $0x7b8] sm:$0xff] }
 0x695   : > { %4341 = vmatprep.subr.mxu1 %v4621_v0  ;;  %4337 = vmatpush3.msra.mxu0 %v3428_v29  ;;  %v3487_v29 = vld [vmem:[%s6146_s7 + $0x728] sm:$0xff] }
 0x696   : > { %4338 = vmatprep.mubr.msk.f32.mxu0 %vm4628_vm12, %v4621_v0  ;;  %4342 = vmatpush3.msk.msra.mxu1 %vm417_vm5, %v3461_v30  ;;  %v3506_v30 = vld [vmem:[%s6146_s7 + $0x7b0] sm:$0xff] }
 0x697   : > { %4339 = vmatmul.mubr.msk.f32.vlgmr.msra.gmra.mxu0 %vm585_vm6, %v2584_v31  ;;  %4343 = vmatprep.subr.mxu1 %v4621_v0  ;;  %v3486_v31 = vld [vmem:[%s6146_s7 + $0x720] sm:$0xff] }
 0x698   : > { %4376 = vmatprep.subr.mxu0 %v4621_v0  ;;  %4344 = vmatpush3.msra.mxu1 %v3460_v32  ;;  %v3505_v32 = vld [vmem:[%s6146_s7 + $0x7a8] sm:$0xff] }
 0x699   : > { %4377 = vmatpush3.msk.msra.mxu0 %vm417_vm5, %v3479_v33  ;;  %4345 = vmatprep.subr.mxu1 %v4621_v0 }
 0x69a   : > { %4378 = vmatprep.subr.mxu0 %v4621_v0  ;;  %4346 = vmatpush3.msra.mxu1 %v3459_v35  ;;  %v3485_v35 = vld [vmem:[%s6146_s7 + $0x718] sm:$0xff] }
 0x69b   : > { %4379 = vmatpush3.msra.mxu0 %v3478_v36  ;;  %4347 = vmatprep.subr.mxu1 %v4621_v0 }
 0x69c   : > { %4380 = vmatprep.subr.mxu0 %v4621_v0  ;;  %4348 = vmatpush3.msra.mxu1 %v3458_v37  ;;  %v3504_v37 = vld [vmem:[%s6146_s7 + $0x7a0] sm:$0xff] }
 0x69d   : > { %4381 = vmatpush3.msra.mxu0 %v3477_v39  ;;  %4349 = vmatprep.subr.mxu1 %v4621_v0 }
 0x69e   : > { %4382 = vmatprep.subr.mxu0 %v4621_v0  ;;  %4350 = vmatpush3.msra.mxu1 %v3457_v40  ;;  %v3484_v40 = vld [vmem:[%s6146_s7 + $0x710] sm:$0xff] }
 0x69f   : > { %4383 = vmatpush3.msra.mxu0 %v3476_v41  ;;  %4351 = vmatprep.subr.mxu1 %v4621_v0 }
 0x6a0   : > { %4384 = vmatprep.subr.mxu0 %v4621_v0  ;;  %4352 = vmatpush3.msra.mxu1 %v3456_v42  ;;  %v3503_v42 = vld [vmem:[%s6146_s7 + $0x798] sm:$0xff] }
 0x6a1   : > { %4385 = vmatpush3.msra.mxu0 %v3475_v43  ;;  %4353 = vmatprep.subr.mxu1 %v4621_v0 }
 0x6a2   : > { %4386 = vmatprep.subr.mxu0 %v4621_v0  ;;  %4354 = vmatpush3.msra.mxu1 %v3455_v44  ;;  %v3483_v44 = vld [vmem:[%s6146_s7 + $0x708] sm:$0xff] }
 0x6a3   : > { %4387 = vmatpush3.msra.mxu0 %v3474_v46  ;;  %4355 = vmatprep.subr.mxu1 %v4621_v0 }
 0x6a4   : > { %4388 = vmatprep.subr.mxu0 %v4621_v0  ;;  %4356 = vmatpush3.msra.mxu1 %v3454_v47  ;;  %v3502_v47 = vld [vmem:[%s6146_s7 + $0x790] sm:$0xff] }
 0x6a5   : > { %4389 = vmatpush3.msra.mxu0 %v3473_v48  ;;  %4357 = vmatprep.subr.mxu1 %v4621_v0  ;;  %v3482_v48 = vld [vmem:[%s6146_s7 + $0x700] sm:$0xff] }
 0x6a6   : > { %4390 = vmatprep.subr.mxu0 %v4621_v0  ;;  %4358 = vmatpush3.msra.mxu1 %v3453_v49  ;;  %v3501_v49 = vld [vmem:[%s6146_s7 + $0x788] sm:$0xff] }
 0x6a7   : > { %4391 = vmatpush3.msra.mxu0 %v3472_v50  ;;  %4359 = vmatprep.subr.mxu1 %v4621_v0  ;;  %v2866_v50 = vrot.slane %v5606_v60, 6 }
 0x6a8   : > { %4392 = vmatprep.subr.mxu0 %v4621_v0  ;;  %4360 = vmatpush3.msra.mxu1 %v3452_v51  ;;  %v3500_v51 = vld [vmem:[%s6146_s7 + $0x780] sm:$0xff] }
 0x6a9   : > { %4393 = vmatpush3.msra.mxu0 %v3471_v52  ;;  %4361 = vmatprep.subr.mxu1 %v4621_v0  ;;  %v2960_v52 = vrot.slane %v5606_v60, 7  ;;  %v3050_v60 = vld [vmem:[%s6148_s9 + $0x60] sm:$0xf] }
 0x6aa   : > { %4394 = vmatprep.subr.mxu0 %v4621_v0  ;;  %4362 = vmatpush3.msra.mxu1 %v3451_v53 }
 0x6ab   : > { %4395 = vmatpush3.msra.mxu0 %v3470_v54  ;;  %4363 = vmatprep.subr.mxu1 %v4621_v0 }
 0x6ac   : > { %4396 = vmatprep.subr.mxu0 %v4621_v0  ;;  %4364 = vmatpush3.msra.mxu1 %v3450_v55  ;;  %v1622_v61 = vpop.f32.mrf.mxu1 }
 0x6ad   : > { %4397 = vmatpush3.msra.mxu0 %v3469_v56  ;;  %4365 = vmatprep.subr.mxu1 %v4621_v0  ;;  %v1626_v38 = vadd.f32 %v1622_v61, %v1533_v57  ;;  %v3048_v61 = vld [vmem:[%s6148_s9 + $0x50] sm:$0xff] }
 0x6ae   : > { %4398 = vmatprep.subr.mxu0 %v4621_v0  ;;  %4366 = vmatpush3.msra.mxu1 %v3449_v58  ;;  %v3955_v63 = vpop.f32.mrf.mxu1  ;;  %v1716_v1 = vpop.f32.mrf.mxu0 }
 0x6af   : > { %4399 = vmatpush3.msra.mxu0 %v3468_v59  ;;  %4367 = vmatprep.subr.mxu1 %v4621_v0  ;;  %v5875_v3 = vadd.f32 %v1716_v1, %v1626_v38  ;;  %v3049_v59 = vld [vmem:[%s6148_s9 + $0x58] sm:$0xff]  ;;  %v3046_v38 = vld [vmem:[%s6148_s9 + $0x40] sm:$0xff]  ;;  %v3044_v63 = vld [vmem:[%s6148_s9 + $0x30] sm:$0xff] }
 0x6b0   : > { %4400 = vmatprep.subr.mxu0 %v4621_v0  ;;  %4368 = vmatpush3.msra.mxu1 %v3448_v34  ;;  %v3990_v5 = vpop.f32.mrf.mxu0  ;;  %v3047_v34 = vld [vmem:[%s6148_s9 + $0x48] sm:$0xff] }
 0x6b1   : > { %4401 = vmatpush3.msra.mxu0 %v3467_v62  ;;  %4369 = vmatprep.subr.mxu1 %v4621_v0  ;;  %v3045_v62 = vld [vmem:[%s6148_s9 + $0x38] sm:$0xff]  ;;  %v3043_v1 = vld [vmem:[%s6148_s9 + $0x28] sm:$0xff] }
 0x6b2   : > { %4402 = vmatprep.subr.mxu0 %v4621_v0  ;;  %4370 = vmatpush3.msra.mxu1 %v3447_v2  ;;  %v3042_v2 = vld [vmem:[%s6148_s9 + $0x20] sm:$0xff] }
 0x6b3   : > { %4403 = vmatpush3.msra.mxu0 %v3466_v4  ;;  %4371 = vmatprep.subr.mxu1 %v4621_v0 }
 0x6b4   : > { %4404 = vmatprep.subr.mxu0 %v4621_v0  ;;  %4372 = vmatpush3.msra.mxu1 %v3446_v6 }
 0x6b5   : > { %4373 = vmatprep.mubr.msk.f32.mxu1 %vm4628_vm12, %v4621_v0  ;;  %4405 = vmatpush3.msra.mxu0 %v3465_v7 }
 0x6b6   : > { %4374 = vmatmul.mubr.msk.f32.vlgmr.msra.gmra.mxu1 %vm585_vm6, %v2678_v8  ;;  %4406 = vmatprep.subr.mxu0 %v4621_v0 }
 0x6b7   : > { %4411 = vmatprep.subr.mxu1 %v4621_v0  ;;  %4407 = vmatpush3.msra.mxu0 %v3464_v9  ;;  %v3041_v9 = vld [vmem:[%s6148_s9 + $0x18] sm:$0xff] }
 0x6b8   : > { %4408 = vmatprep.mubr.msk.f32.mxu0 %vm4628_vm12, %v4621_v0  ;;  %4412 = vmatpush3.msk.msra.mxu1 %vm417_vm5, %v3497_v10  ;;  %v3040_v10 = vld [vmem:[%s6148_s9 + $0x10] sm:$0xff] }
 0x6b9   : > { %4409 = vmatmul.mubr.msk.f32.vlgmr.msra.gmra.mxu0 %vm585_vm6, %v2772_v11  ;;  %4413 = vmatprep.subr.mxu1 %v4621_v0  ;;  %v3039_v11 = vld [vmem:[%s6148_s9 + $0x8] sm:$0xff] }
 0x6ba   : > { %4446 = vmatprep.subr.mxu0 %v4621_v0  ;;  %4414 = vmatpush3.msra.mxu1 %v3496_v12  ;;  %v3038_v12 = vld [vmem:[%s6148_s9] sm:$0xff] }
 0x6bb   : > { %4447 = vmatpush3.msk.msra.mxu0 %vm417_vm5, %v3515_v13  ;;  %4415 = vmatprep.subr.mxu1 %v4621_v0 }
 0x6bc   : > { %4448 = vmatprep.subr.mxu0 %v4621_v0  ;;  %4416 = vmatpush3.msra.mxu1 %v3495_v14 }
 0x6bd   : > { %4449 = vmatpush3.msra.mxu0 %v3514_v15  ;;  %4417 = vmatprep.subr.mxu1 %v4621_v0 }
 0x6be   : > { %4450 = vmatprep.subr.mxu0 %v4621_v0  ;;  %4418 = vmatpush3.msra.mxu1 %v3494_v16 }
 0x6bf   : > { %4451 = vmatpush3.msra.mxu0 %v3513_v17  ;;  %4419 = vmatprep.subr.mxu1 %v4621_v0 }
 0x6c0   : > { %4452 = vmatprep.subr.mxu0 %v4621_v0  ;;  %4420 = vmatpush3.msra.mxu1 %v3493_v18 }
 0x6c1   : > { %4453 = vmatpush3.msra.mxu0 %v3512_v19  ;;  %4421 = vmatprep.subr.mxu1 %v4621_v0 }
 0x6c2   : > { %4454 = vmatprep.subr.mxu0 %v4621_v0  ;;  %4422 = vmatpush3.msra.mxu1 %v3492_v20 }
 0x6c3   : > { %4455 = vmatpush3.msra.mxu0 %v3511_v21  ;;  %4423 = vmatprep.subr.mxu1 %v4621_v0 }
 0x6c4   : > { %4456 = vmatprep.subr.mxu0 %v4621_v0  ;;  %4424 = vmatpush3.msra.mxu1 %v3491_v22 }
 0x6c5   : > { %4457 = vmatpush3.msra.mxu0 %v3510_v23  ;;  %4425 = vmatprep.subr.mxu1 %v4621_v0 }
 0x6c6   : > { %4458 = vmatprep.subr.mxu0 %v4621_v0  ;;  %4426 = vmatpush3.msra.mxu1 %v3490_v24 }
 0x6c7   : > { %4459 = vmatpush3.msra.mxu0 %v3509_v25  ;;  %4427 = vmatprep.subr.mxu1 %v4621_v0 }
 0x6c8   : > { %4460 = vmatprep.subr.mxu0 %v4621_v0  ;;  %4428 = vmatpush3.msra.mxu1 %v3489_v26 }
 0x6c9   : > { %4461 = vmatpush3.msra.mxu0 %v3508_v27  ;;  %4429 = vmatprep.subr.mxu1 %v4621_v0 }
 0x6ca   : > { %4462 = vmatprep.subr.mxu0 %v4621_v0  ;;  %4430 = vmatpush3.msra.mxu1 %v3488_v28 }
 0x6cb   : > { %4463 = vmatpush3.msra.mxu0 %v3507_v45  ;;  %4431 = vmatprep.subr.mxu1 %v4621_v0 }
 0x6cc   : > { %4464 = vmatprep.subr.mxu0 %v4621_v0  ;;  %4432 = vmatpush3.msra.mxu1 %v3487_v29  ;;  %v1810_v33 = vpop.f32.mrf.mxu1 }
 0x6cd   : > { %4465 = vmatpush3.msra.mxu0 %v3506_v30  ;;  %4433 = vmatprep.subr.mxu1 %v4621_v0  ;;  %v1814_v36 = vadd.f32 %v1810_v33, %v5875_v3 }
 0x6ce   : > { %4466 = vmatprep.subr.mxu0 %v4621_v0  ;;  %4434 = vmatpush3.msra.mxu1 %v3486_v31  ;;  %v4025_v39 = vpop.f32.mrf.mxu1 }
 0x6cf   : > { %4467 = vmatpush3.msra.mxu0 %v3505_v32  ;;  %4435 = vmatprep.subr.mxu1 %v4621_v0  ;;  %v1904_v41 = vpop.f32.mrf.mxu0 }
 0x6d0   : > { %4468 = vmatprep.subr.mxu0 %v4621_v0  ;;  %4436 = vmatpush3.msra.mxu1 %v3485_v35  ;;  %v1908_v43 = vadd.f32 %v1904_v41, %v1814_v36 }
 0x6d1   : > { %4469 = vmatpush3.msra.mxu0 %v3504_v37  ;;  %4437 = vmatprep.subr.mxu1 %v4621_v0  ;;  %v4060_v46 = vpop.f32.mrf.mxu0  ;;  %v3051_v37 = vld [vmem:[%s6149_s10] sm:$0x1] }
 0x6d2   : > { %4470 = vmatprep.subr.mxu0 %v4621_v0  ;;  %4438 = vmatpush3.msra.mxu1 %v3484_v40 }
 0x6d3   : > { %4471 = vmatpush3.msra.mxu0 %v3503_v42  ;;  %4439 = vmatprep.subr.mxu1 %v4621_v0 }
 0x6d4   : > { %4472 = vmatprep.subr.mxu0 %v4621_v0  ;;  %4440 = vmatpush3.msra.mxu1 %v3483_v44 }
 0x6d5   : > { %4473 = vmatpush3.msra.mxu0 %v3502_v47  ;;  %4441 = vmatprep.subr.mxu1 %v4621_v0 }
 0x6d6   : > { %4474 = vmatprep.subr.mxu0 %v4621_v0  ;;  %4442 = vmatpush3.msra.mxu1 %v3482_v48 }
 0x6d7   : > { %4443 = vmatprep.mubr.msk.f32.mxu1 %vm4628_vm12, %v4621_v0  ;;  %4475 = vmatpush3.msra.mxu0 %v3501_v49 }
 0x6d8   : > { %4444 = vmatmul.mubr.msk.f32.vlgmr.msra.gmra.mxu1 %vm585_vm6, %v2866_v50  ;;  %4476 = vmatprep.subr.mxu0 %v4621_v0 }
 0x6d9   : > { %4477 = vmatpush3.msra.mxu0 %v3500_v51  ;;  %4478 = vmatprep.mubr.msk.f32.mxu0 %vm4628_vm12, %v4621_v0 }
 0x6da   : > { %4479 = vmatmul.mubr.msk.f32.vlgmr.msra.gmra.mxu0 %vm585_vm6, %v2960_v52  ;;  %4481 = vmatprep.subr.mxu1 %v4621_v0 }
 0x6db   : > { %4507 = vmatprep.mubr.msk.f32.mxu1 %vm4628_vm12, %v4621_v0  ;;  %4482 = vmatpush3.msk.msra.mxu1 %vm3056_vm13, %v3050_v60 }
 0x6dc   : > { %4483 = vmatprep.subr.mxu1 %v4621_v0 }
 0x6dd   : > { %4484 = vmatpush3.msra.mxu1 %v3049_v59 }
 0x6de   : > { %4485 = vmatprep.subr.mxu1 %v4621_v0 }
 0x6df   : > { %4486 = vmatpush3.msra.mxu1 %v3048_v61 }
 0x6e0   : > { %4487 = vmatprep.subr.mxu1 %v4621_v0 }
 0x6e1   : > { %4488 = vmatpush3.msra.mxu1 %v3047_v34 }
 0x6e2   : > { %4489 = vmatprep.subr.mxu1 %v4621_v0 }
 0x6e3   : > { %4490 = vmatpush3.msra.mxu1 %v3046_v38 }
 0x6e4   : > { %4491 = vmatprep.subr.mxu1 %v4621_v0 }
 0x6e5   : > { %4492 = vmatpush3.msra.mxu1 %v3045_v62 }
 0x6e6   : > { %4493 = vmatprep.subr.mxu1 %v4621_v0 }
 0x6e7   : > { %4494 = vmatpush3.msra.mxu1 %v3044_v63 }
 0x6e8   : > { %4495 = vmatprep.subr.mxu1 %v4621_v0 }
 0x6e9   : > { %4496 = vmatpush3.msra.mxu1 %v3043_v1 }
 0x6ea   : > { %4497 = vmatprep.subr.mxu1 %v4621_v0 }
 0x6eb   : > { %4498 = vmatpush3.msra.mxu1 %v3042_v2 }
 0x6ec   : > { %4499 = vmatprep.subr.mxu1 %v4621_v0 }
 0x6ed   : > { %4500 = vmatpush3.msra.mxu1 %v3041_v9 }
 0x6ee   : > { %v1998_v53 = vpop.f32.mrf.mxu1  ;;  %4501 = vmatprep.subr.mxu1 %v4621_v0 }
 0x6ef   : > { %v2002_v54 = vadd.f32 %v1998_v53, %v1908_v43  ;;  %4502 = vmatpush3.msra.mxu1 %v3040_v10 }
 0x6f0   : > { %v4095_v55 = vpop.f32.mrf.mxu1  ;;  %4503 = vmatprep.subr.mxu1 %v4621_v0 }
 0x6f1   : > { %v2092_v56 = vpop.f32.mrf.mxu0  ;;  %4504 = vmatpush3.msra.mxu1 %v3039_v11 }
 0x6f2   : > { %v2096_v57 = vadd.f32 %v2092_v56, %v2002_v54  ;;  %4505 = vmatprep.subr.mxu1 %v4621_v0 }
 0x6f3   : > { %v4130_v58 = vpop.f32.mrf.mxu0  ;;  %4506 = vmatpush3.msra.mxu1 %v3038_v12 }
 0x710   : > { %v2186_v3 = vpop.f32.mrf.mxu1 }
 0x711   : > { %v2190_v4 = vadd.f32 %v2186_v3, %v2096_v57 }
 0x712   : > { %v4165_v5 = vpop.f32.mrf.mxu1 }
 0x713   : > { %v2280_v6 = vpop.f32.mrf.mxu0 }
 0x714   : > { %v2284_v7 = vadd.f32 %v2280_v6, %v2190_v4 }
 0x715   : > { %v4200_v8 = vpop.f32.mrf.mxu0 }
 0x732   : > { %v2374_v13 = vpop.f32.mrf.mxu1 }
 0x733   : > { %v2378_v14 = vadd.f32 %v2374_v13, %v2284_v7 }
 0x734   : > { %v4235_v15 = vpop.f32.mrf.mxu1 }
 0x735   : > { %v2468_v16 = vpop.f32.mrf.mxu0 }
 0x736   : > { %v2472_v17 = vadd.f32 %v2468_v16, %v2378_v14 }
 0x737   : > { %v4270_v18 = vpop.f32.mrf.mxu0 }
 0x754   : > { %v2562_v19 = vpop.f32.mrf.mxu1 }
 0x755   : > { %v2566_v26 = vadd.f32 %v2562_v19, %v2472_v17 }
 0x756   : > { %v4305_v20 = vpop.f32.mrf.mxu1 }
 0x757   : > { %v2656_v21 = vpop.f32.mrf.mxu0 }
 0x758   : > { %v2660_v27 = vadd.f32 %v2656_v21, %v2566_v26 }
 0x759   : > { %v4340_v22 = vpop.f32.mrf.mxu0 }
 0x776   : > { %v2750_v23 = vpop.f32.mrf.mxu1 }
 0x777   : > { %v2754_v28 = vadd.f32 %v2750_v23, %v2660_v27 }
 0x778   : > { %v4375_v24 = vpop.f32.mrf.mxu1 }
 0x779   : > { %v2844_v25 = vpop.f32.mrf.mxu0 }
 0x77a   : > { %v2848_v45 = vadd.f32 %v2844_v25, %v2754_v28 }
 0x77b   : > { %v4410_v0 = vpop.f32.mrf.mxu0 }
 0x798   : > { %v2938_v29 = vpop.f32.mrf.mxu1 }
 0x799   : > { %v2942_v30 = vadd.f32 %v2938_v29, %v2848_v45 }
 0x79a   : > { %v4445_v31 = vpop.f32.mrf.mxu1  ;;  %v3032_v32 = vpop.f32.mrf.mxu0 }
 0x79b   : > { %v3036_v33 = vadd.f32 %v3032_v32, %v2942_v30 }
 0x79c   : > { %v4480_v35 = vpop.f32.mrf.mxu0 }
 0x79d   : > { %v3037_v36 = vmax.f32 %v3036_v33, 0.0 }
 0x79f   : > { %4508 = vmatmul.mubr.msk.f32.vlgmr.msra.gmra.mxu1 %vm3052_vm14, %v3037_v36 }
 0x85f   : > { %v3126_v39 = vpop.f32.mrf.mxu1 }
 0x860   : > { %v3127_v40 = vadd.f32 %v3126_v39, %v3051_v37 }
 0x861   : > { %v4509_v41 = vpop.f32.mrf.mxu1 }
 0x862   : > { %3131 = vst.msk [vmem:[%s376_s13] sm:$0x1] %vm3130_vm15, %v3127_v40 }
 0x863   : > { %4572 = shalt.err (!%p4569_p3)
}
 0x864   : > { %s4573_s12 = scalar_lea.hbm %s6104_s29, 16  ;;  %s4577_s16 = scalar_lea.hbm %s6150_s11, 32 }
 0x865   : > { %p4574_p4 = scmp.ne.s32.totalorder %s6104_s29, %s4573_s12  ;;  %p4578_p9 = scmp.lt.s32.totalorder %s6104_s29, %s6150_s11 }
 0x866   : > { %p4579_p10 = scmp.lt.s32.totalorder %s4577_s16, %s4573_s12 }
 0x867   : > { %p4575_p7 = pnand %p4574_p4, %p4728_p5 }
 0x868   : > { %p4580_p11 = por %p4579_p10, %p4578_p9 }
 0x869   : > { %p4576_p8 = pneg %p4575_p7 }
 0x86b   : > { %p4581_p12 = pnand %p4580_p11, %p4576_p8 }
 0x86d   : > { %4584 = shalt.err (!%p4581_p12)
}
 0x86e   : > { %4510 = dma.vmem_to_hbm [thread:$0]  (%p4728_p5), %s3146_s14, 16, %s6104_s29, %s3133_s25  }
 0x86f PF: > { %p4516_p13 = scmp.ge.s32.totalorder %s4619_s20, 2  ;;  %s3157_s0 = sand.u32 1, %s4607_s17  }
 0x870   : > { %s3158_s15 = scalar_lea.sflag [#allocation4], %s3157_s0 }
 0x871   : > { %p4513_p0 = pnand %p4516_p13, %p4732_p6 }
 0x873   : > { %p4514_p1 = pneg %p4513_p0 }
 0x875   : > { %4602 = dma.done.wait (%p4514_p1), %s3158_s15, 16  }
 0x876   : > { %4604 = vsyncadd (%p4514_p1), %s3158_s15, 4294967280  ;;  %p21_p2 = scmp.ge.s32.totalorder %s4715_s23, 4   ;;  %s6155_s17 = smov %s4611_s18 }
 0x877   : > { %s6156_s18 = smov %s4615_s19  ;;  %s6157_s19 = smov %s4726_s26 }
 0x878   : > { %s6158_s20 = smov %s4715_s23  ;;  %23 = sbr.rel (!%p21_p2) target bundleno = 5 (0x5), region = 122 }
 0x87d   :  { %3162 = vsyncpa [#allocation4], 1 }
 0x87e   :  { %3164 = vsyncpa [#allocation4 + $0x1], 1 }

</bundles_post_ra>
